<compile_context>
chip_gen: v5e
topology: v5e:2x2
jax: 0.10.0
libtpu: 0.0.40
codegen_flags: <defaults>
</compile_context>

<pallas_src>
import functools

import jax
import jax.numpy as jnp
from jax.experimental import pallas as pl
from jax.experimental.pallas import tpu as pltpu


def _mha_kernel(x_ref, wq_ref, wk_ref, wv_ref, wproj_ref, bproj_ref, out_ref,
                kh_ref, vh_ref, *, num_heads, compute_dtype):
    # x_ref:     (1, N, C)   full sequence for this batch element (input dtype)
    # wq_ref:    (C, C)      pre-transposed, pre-scaled Q weight (compute dtype)
    # wk_ref:    (C, C)      pre-transposed K weight (compute dtype)
    # wv_ref:    (C, C)      pre-transposed V weight (compute dtype)
    # wproj_ref: (C, C)      pre-transposed output-projection weight (compute dtype)
    # bproj_ref: (1, C)      f32 bias
    # out_ref:   (1, tq, C)
    # kh_ref:    (H, N, D)   persistent VMEM scratch -- cached K, head-batched layout
    # vh_ref:    (H, N, D)   persistent VMEM scratch -- cached V, head-batched layout
    qt = pl.program_id(1)
    _, N, C = x_ref.shape
    tq = out_ref.shape[1]
    H = num_heads
    D = C // H

    # (Re)project + relayout K and V only once per batch element.
    @pl.when(qt == 0)
    def _():
        xs = x_ref[0].astype(compute_dtype)                             # (N, C)
        k = jnp.dot(xs, wk_ref[...], preferred_element_type=jnp.float32)  # (N, C)
        v = jnp.dot(xs, wv_ref[...], preferred_element_type=jnp.float32)  # (N, C)
        kh_ref[...] = jnp.transpose(k.reshape(N, H, D), (1, 0, 2)).astype(compute_dtype)
        vh_ref[...] = jnp.transpose(v.reshape(N, H, D), (1, 0, 2)).astype(compute_dtype)

    # Query rows for this tile, sliced out of the resident full-sequence block.
    start = qt * tq
    if tq % 8 == 0:
        start = pl.multiple_of(start, 8)
    xq = x_ref[0, pl.ds(start, tq), :].astype(compute_dtype)            # (tq, C)

    # Q projection (scale already folded into the weight).
    q = jnp.dot(xq, wq_ref[...], preferred_element_type=jnp.float32)    # (tq, C)
    qh = jnp.transpose(q.reshape(tq, H, D), (1, 0, 2)).astype(compute_dtype)  # (H, tq, D)

    # Scores for all heads in one batched matmul; softmax kept in f32 (v5e-safe).
    s = jnp.einsum('hqd,hkd->hqk', qh, kh_ref[...],
                   preferred_element_type=jnp.float32)                  # (H, tq, N)
    s = s - jnp.max(s, axis=-1, keepdims=True)
    p = jnp.exp(s)
    p = p * pl.reciprocal(jnp.sum(p, axis=-1, keepdims=True), approx=True)

    o = jnp.einsum('hqk,hkd->hqd', p.astype(compute_dtype), vh_ref[...],
                   preferred_element_type=jnp.float32)                  # (H, tq, D)
    attn_out = jnp.transpose(o, (1, 0, 2)).reshape(tq, C)               # (tq, C)

    # Output projection + bias.
    y = jnp.dot(attn_out.astype(compute_dtype), wproj_ref[...],
                preferred_element_type=jnp.float32)
    y = y + bproj_ref[0]
    out_ref[0] = y.astype(out_ref.dtype)


def multi_head_attention(x, w_qkv, w_proj, b_proj, *, num_heads, tq=None,
                         compute_dtype=None):
    """Forward pass of Multi_Head_Attention.

    x:      (B, N, C)
    w_qkv:  (3C, C)  nn.Linear weight (out_features, in_features), no bias
    w_proj: (C, C)   nn.Linear weight
    b_proj: (C,)     nn.Linear bias

    Pass compute_dtype=jnp.bfloat16 on v6e/v7x for bf16 MXU matmuls with f32
    accumulation (softmax always stays in f32).
    """
    B, N, C = x.shape
    assert C % num_heads == 0, "dim must be divisible by num_heads"
    D = C // num_heads
    scale = D ** (-0.5)

    if compute_dtype is None:
        compute_dtype = x.dtype
    if tq is None:
        tq = N                               # single query tile by default
    assert N % tq == 0, "sequence length must be divisible by the query tile"
    # Minimum sublane tile depends on the input dtype (8 for f32, 16 for bf16).
    min_sub = 8 * (4 // jnp.dtype(x.dtype).itemsize)
    assert tq == N or tq % min_sub == 0, \
        f"query tile must be a multiple of {min_sub} (or full N)"
    num_q_tiles = N // tq

    # --- Weight prep (outside the kernel) ------------------------------------
    # Pre-transpose; fold the attention scale into Wq in f32 BEFORE casting.
    w_qkv_f32 = jnp.asarray(w_qkv, jnp.float32)
    w_q_t = (w_qkv_f32[:C] * jnp.float32(scale)).T.astype(compute_dtype)   # (C, C)
    w_k_t = w_qkv_f32[C:2 * C].T.astype(compute_dtype)                     # (C, C)
    w_v_t = w_qkv_f32[2 * C:].T.astype(compute_dtype)                      # (C, C)
    w_proj_t = jnp.asarray(w_proj, jnp.float32).T.astype(compute_dtype)    # (C, C)
    b_proj2d = jnp.asarray(b_proj, jnp.float32).reshape(1, C)              # (1, C)

    # --- Generation-aware VMEM budget ----------------------------------------
    x_b = jnp.dtype(x.dtype).itemsize
    c_b = jnp.dtype(compute_dtype).itemsize
    rup = lambda a, m: ((a + m - 1) // m) * m
    C_pad, N_pad, D_pad = rup(C, 128), rup(N, 128), rup(D, 128)

    io_bytes = (2 * N * C_pad * x_b            # x block (double-buffered)
                + 2 * tq * C_pad * x_b         # out block (double-buffered)
                + 2 * 4 * C * C_pad * c_b      # weights (worst case: double-buffered)
                + 2 * C_pad * 4)               # bias
    scratch_bytes = 2 * num_heads * rup(N, 8) * D_pad * c_b          # kh, vh caches
    live_bytes = 4 * (2 * N * C_pad                                  # k, v at qt == 0
                      + 3 * tq * C_pad                               # q, attn_out, y
                      + 2 * num_heads * tq * N_pad                   # s, p
                      + 2 * num_heads * tq * D_pad)                  # qh, o
    needed = io_bytes + scratch_bytes + 2 * live_bytes               # 2x relayout headroom
    try:
        vmem_cap = int(pltpu.get_tpu_info().vmem_capacity_bytes)
    except Exception:
        vmem_cap = 64 << 20                   # conservative (v7x per-TC capacity)
    vmem_limit = int(min(max(needed, 32 << 20), (3 * vmem_cap) // 4))

    kernel = functools.partial(_mha_kernel, num_heads=num_heads,
                               compute_dtype=compute_dtype)

    def _in_specs(single_buffer_consts):
        const_kw = ({"pipeline_mode": pl.Buffered(1)} if single_buffer_consts else {})
        return [
            # x: full sequence for this batch element (double-buffered across b).
            pl.BlockSpec((1, N, C), lambda b, qt: (b, 0, 0)),
            # Constant operands: index never changes -> single-buffer if supported.
            pl.BlockSpec((C, C), lambda b, qt: (0, 0), **const_kw),
            pl.BlockSpec((C, C), lambda b, qt: (0, 0), **const_kw),
            pl.BlockSpec((C, C), lambda b, qt: (0, 0), **const_kw),
            pl.BlockSpec((C, C), lambda b, qt: (0, 0), **const_kw),
            pl.BlockSpec((1, C), lambda b, qt: (0, 0), **const_kw),
        ]

    def _call(single_buffer_consts):
        return pl.pallas_call(
            kernel,
            out_shape=jax.ShapeDtypeStruct((B, N, C), x.dtype),
            grid_spec=pltpu.PrefetchScalarGridSpec(
                num_scalar_prefetch=0,
                grid=(B, num_q_tiles),
                in_specs=_in_specs(single_buffer_consts),
                out_specs=pl.BlockSpec((1, tq, C), lambda b, qt: (b, qt, 0)),
                scratch_shapes=[
                    pltpu.VMEM((num_heads, N, D), compute_dtype),   # cached K (H, N, D)
                    pltpu.VMEM((num_heads, N, D), compute_dtype),   # cached V (H, N, D)
                ],
            ),
            compiler_params=pltpu.CompilerParams(
                # qt must be "arbitrary": it reuses the K/V scratch written at qt == 0.
                dimension_semantics=("parallel", "arbitrary"),
                vmem_limit_bytes=vmem_limit),
        )(x, w_q_t, w_k_t, w_v_t, w_proj_t, b_proj2d)

    try:
        return _call(True)
    except Exception:
        # TODO(synk): pipeline_mode=pl.Buffered(1) not accepted by this jax build;
        # fall back to default (double-buffered) constant operands.
        return _call(False)


def _reference(x, w_qkv, w_proj, b_proj, num_heads):
    B, N, C = x.shape
    D = C // num_heads
    scale = D ** (-0.5)
    qkv = jnp.einsum('bnc,oc->bno', x, w_qkv)                       # (B, N, 3C)
    qkv = qkv.reshape(B, N, 3, num_heads, D).transpose(2, 0, 3, 1, 4)
    q, k, v = qkv[0], qkv[1], qkv[2]                                # (B, H, N, D)
    attn = jnp.einsum('bhnd,bhmd->bhnm', q, k) * scale
    attn = jax.nn.softmax(attn, axis=-1)
    out = jnp.einsum('bhnm,bhmd->bhnd', attn, v)                    # (B, H, N, D)
    out = out.transpose(0, 2, 1, 3).reshape(B, N, C)
    return jnp.einsum('bnc,oc->bno', out, w_proj) + b_proj


if __name__ == "__main__":
    # batch=2, seq=16, dim=32, heads=4 (head_dim=8); tq=8 exercises both the
    # cached-K/V path (qt > 0) and the in-kernel query-tile slicing.
    B, N, C, H = 2, 16, 32, 4

    key = jax.random.PRNGKey(0)
    kx, kqkv, kproj, kb = jax.random.split(key, 4)

    x = jax.random.normal(kx, (B, N, C), dtype=jnp.float32)
    # Deterministic synthetic parameters; shapes match the nn.Linear weights.
    w_qkv = jax.random.normal(kqkv, (3 * C, C), dtype=jnp.float32) * 0.05
    w_proj = jax.random.normal(kproj, (C, C), dtype=jnp.float32) * 0.05
    b_proj = jax.random.normal(kb, (C,), dtype=jnp.float32) * 0.05

    out = multi_head_attention(x, w_qkv, w_proj, b_proj, num_heads=H, tq=8)
    out = jax.block_until_ready(out)

    ref = _reference(x, w_qkv, w_proj, b_proj, H)
    assert out.shape == (B, N, C)
    # Tolerance accounts for the approximate (EUP) reciprocal in the softmax.
    assert jnp.allclose(out, ref, atol=1e-3, rtol=1e-3), \
        f"mismatch vs reference, max err {jnp.max(jnp.abs(out - ref))}"

    print("KERNEL_OK")
</pallas_src>

<mosaic_0001>
module attributes {stable_mosaic.version = 11 : i64} {
  func.func @_mha_kernel(%arg0: i32, %arg1: i32, %arg2: memref<1x16x32xf32, #tpu.memory_space<vmem>>, %arg3: memref<32x32xf32, #tpu.memory_space<vmem>>, %arg4: memref<32x32xf32, #tpu.memory_space<vmem>>, %arg5: memref<32x32xf32, #tpu.memory_space<vmem>>, %arg6: memref<32x32xf32, #tpu.memory_space<vmem>>, %arg7: memref<1x32xf32, #tpu.memory_space<vmem>>, %arg8: memref<1x8x32xf32, #tpu.memory_space<vmem>>, %arg9: memref<4x16x8xf32, #tpu.memory_space<vmem>>, %arg10: memref<4x16x8xf32, #tpu.memory_space<vmem>>) attributes {dimension_semantics = [#tpu.dimension_semantics<parallel>, #tpu.dimension_semantics<arbitrary>], iteration_bounds = array<i64: 2, 2>, scalar_prefetch = 0 : i64, scratch_operands = 2 : i64, tpu.core_type = #tpu.core_type<tc>, window_params = [{transform_indices = @transform_0, window_bounds = array<i64: 1, 16, 32>}, {pipeline_mode = #tpu.pipeline_mode<synchronous>, transform_indices = @transform_1, window_bounds = array<i64: 32, 32>}, {pipeline_mode = #tpu.pipeline_mode<synchronous>, transform_indices = @transform_2, window_bounds = array<i64: 32, 32>}, {pipeline_mode = #tpu.pipeline_mode<synchronous>, transform_indices = @transform_3, window_bounds = array<i64: 32, 32>}, {pipeline_mode = #tpu.pipeline_mode<synchronous>, transform_indices = @transform_4, window_bounds = array<i64: 32, 32>}, {pipeline_mode = #tpu.pipeline_mode<synchronous>, transform_indices = @transform_5, window_bounds = array<i64: 1, 32>}, {transform_indices = @transform_6, window_bounds = array<i64: 1, 8, 32>}]} {
    %c0_i32 = arith.constant 0 : i32
    %0 = arith.cmpi eq, %arg1, %c0_i32 : i32
    %1 = arith.extui %0 : i1 to i32
    %c0_i32_0 = arith.constant 0 : i32
    %2 = arith.cmpi ne, %1, %c0_i32_0 : i32
    scf.if %2 {
      %c0_22 = arith.constant 0 : index
      %c0_23 = arith.constant 0 : index
      %c0_24 = arith.constant 0 : index
      %38 = vector.load %arg2[%c0_22, %c0_23, %c0_24] : memref<1x16x32xf32, #tpu.memory_space<vmem>>, vector<1x16x32xf32>
      %39 = vector.shape_cast %38 : vector<1x16x32xf32> to vector<16x32xf32>
      %c0_25 = arith.constant 0 : index
      %c0_26 = arith.constant 0 : index
      %40 = vector.load %arg4[%c0_25, %c0_26] : memref<32x32xf32, #tpu.memory_space<vmem>>, vector<32x32xf32>
      %cst_27 = arith.constant dense<0.000000e+00> : vector<16x32xf32>
      %41 = tpu.matmul %39, %40, %cst_27 {dimension_numbers = #tpu.dot_dimension_numbers<[1], [0], [0], [1], [0, 0, 1, 1], [], []>} : vector<16x32xf32>, vector<32x32xf32>, vector<16x32xf32> -> vector<16x32xf32>
      %c0_28 = arith.constant 0 : index
      %c0_29 = arith.constant 0 : index
      %42 = vector.load %arg5[%c0_28, %c0_29] : memref<32x32xf32, #tpu.memory_space<vmem>>, vector<32x32xf32>
      %cst_30 = arith.constant dense<0.000000e+00> : vector<16x32xf32>
      %43 = tpu.matmul %39, %42, %cst_30 {dimension_numbers = #tpu.dot_dimension_numbers<[1], [0], [0], [1], [0, 0, 1, 1], [], []>} : vector<16x32xf32>, vector<32x32xf32>, vector<16x32xf32> -> vector<16x32xf32>
      %44 = vector.shape_cast %41 : vector<16x32xf32> to vector<16x4x8xf32>
      %45 = tpu.transpose %44, [1, 0, 2] : vector<16x4x8xf32> -> vector<4x16x8xf32>
      %c0_31 = arith.constant 0 : index
      %c0_32 = arith.constant 0 : index
      %c0_33 = arith.constant 0 : index
      %46 = vector.load %arg9[%c0_31, %c0_32, %c0_33] : memref<4x16x8xf32, #tpu.memory_space<vmem>>, vector<4x16x8xf32>
      tpu.vector_store %arg9[%c0_31, %c0_32, %c0_33], %45 {strides = array<i32>} : memref<4x16x8xf32, #tpu.memory_space<vmem>>, vector<4x16x8xf32>,
      %47 = vector.shape_cast %43 : vector<16x32xf32> to vector<16x4x8xf32>
      %48 = tpu.transpose %47, [1, 0, 2] : vector<16x4x8xf32> -> vector<4x16x8xf32>
      %c0_34 = arith.constant 0 : index
      %c0_35 = arith.constant 0 : index
      %c0_36 = arith.constant 0 : index
      %49 = vector.load %arg10[%c0_34, %c0_35, %c0_36] : memref<4x16x8xf32, #tpu.memory_space<vmem>>, vector<4x16x8xf32>
      tpu.vector_store %arg10[%c0_34, %c0_35, %c0_36], %48 {strides = array<i32>} : memref<4x16x8xf32, #tpu.memory_space<vmem>>, vector<4x16x8xf32>,
    } else {
    }
    %c8_i32 = arith.constant 8 : i32
    %3 = arith.muli %arg1, %c8_i32 : i32
    %4 = tpu.assume_multiple %3, 8 : i32
    %c0 = arith.constant 0 : index
    %5 = arith.index_cast %4 : i32 to index
    %c0_1 = arith.constant 0 : index
    %6 = vector.load %arg2[%c0, %5, %c0_1] : memref<1x16x32xf32, #tpu.memory_space<vmem>>, vector<1x8x32xf32>
    %7 = vector.shape_cast %6 : vector<1x8x32xf32> to vector<8x32xf32>
    %c0_2 = arith.constant 0 : index
    %c0_3 = arith.constant 0 : index
    %8 = vector.load %arg3[%c0_2, %c0_3] : memref<32x32xf32, #tpu.memory_space<vmem>>, vector<32x32xf32>
    %cst = arith.constant dense<0.000000e+00> : vector<8x32xf32>
    %9 = tpu.matmul %7, %8, %cst {dimension_numbers = #tpu.dot_dimension_numbers<[1], [0], [0], [1], [0, 0, 1, 1], [], []>} : vector<8x32xf32>, vector<32x32xf32>, vector<8x32xf32> -> vector<8x32xf32>
    %10 = vector.shape_cast %9 : vector<8x32xf32> to vector<8x4x8xf32>
    %11 = tpu.transpose %10, [1, 0, 2] : vector<8x4x8xf32> -> vector<4x8x8xf32>
    %c0_4 = arith.constant 0 : index
    %c0_5 = arith.constant 0 : index
    %c0_6 = arith.constant 0 : index
    %12 = vector.load %arg9[%c0_4, %c0_5, %c0_6] : memref<4x16x8xf32, #tpu.memory_space<vmem>>, vector<4x16x8xf32>
    "tpu.trace_start"() <{level = 10 : i32, message = "hqd,hkd->hqk"}> : () -> ()
    %cst_7 = arith.constant dense<0.000000e+00> : vector<4x8x16xf32>
    %13 = tpu.matmul %11, %12, %cst_7 {dimension_numbers = #tpu.dot_dimension_numbers<[2], [2], [1], [1], [0, 0, 0, 1, 1, 1], [0], [0]>} : vector<4x8x8xf32>, vector<4x16x8xf32>, vector<4x8x16xf32> -> vector<4x8x16xf32>
    "tpu.trace_stop"() : () -> ()
    %cst_8 = arith.constant dense<0xFF800000> : vector<4x8xf32>
    %14 = vector.multi_reduction <maximumf>, %13, %cst_8 [2] : vector<4x8x16xf32> to vector<4x8xf32>
    %15 = vector.shape_cast %14 : vector<4x8xf32> to vector<4x8x1xf32>
    %16 = vector.broadcast %15 : vector<4x8x1xf32> to vector<4x8x16xf32>
    %17 = arith.subf %13, %16 : vector<4x8x16xf32>
    %18 = math.exp %17 : vector<4x8x16xf32>
    %cst_9 = arith.constant dense<0.000000e+00> : vector<4x8xf32>
    %19 = vector.multi_reduction <add>, %18, %cst_9 [2] : vector<4x8x16xf32> to vector<4x8xf32>
    %20 = vector.shape_cast %19 : vector<4x8xf32> to vector<4x8x1xf32>
    %21 = tpu.reciprocal %20 {approx = true} : vector<4x8x1xf32> -> vector<4x8x1xf32>
    %22 = vector.broadcast %21 : vector<4x8x1xf32> to vector<4x8x16xf32>
    %23 = arith.mulf %18, %22 : vector<4x8x16xf32>
    %c0_10 = arith.constant 0 : index
    %c0_11 = arith.constant 0 : index
    %c0_12 = arith.constant 0 : index
    %24 = vector.load %arg10[%c0_10, %c0_11, %c0_12] : memref<4x16x8xf32, #tpu.memory_space<vmem>>, vector<4x16x8xf32>
    "tpu.trace_start"() <{level = 10 : i32, message = "hqk,hkd->hqd"}> : () -> ()
    %cst_13 = arith.constant dense<0.000000e+00> : vector<4x8x8xf32>
    %25 = tpu.matmul %23, %24, %cst_13 {dimension_numbers = #tpu.dot_dimension_numbers<[2], [1], [1], [2], [0, 0, 0, 1, 1, 2], [0], [0]>} : vector<4x8x16xf32>, vector<4x16x8xf32>, vector<4x8x8xf32> -> vector<4x8x8xf32>
    "tpu.trace_stop"() : () -> ()
    %26 = tpu.transpose %25, [1, 0, 2] : vector<4x8x8xf32> -> vector<8x4x8xf32>
    %27 = vector.shape_cast %26 : vector<8x4x8xf32> to vector<8x32xf32>
    %c0_14 = arith.constant 0 : index
    %c0_15 = arith.constant 0 : index
    %28 = vector.load %arg6[%c0_14, %c0_15] : memref<32x32xf32, #tpu.memory_space<vmem>>, vector<32x32xf32>
    %cst_16 = arith.constant dense<0.000000e+00> : vector<8x32xf32>
    %29 = tpu.matmul %27, %28, %cst_16 {dimension_numbers = #tpu.dot_dimension_numbers<[1], [0], [0], [1], [0, 0, 1, 1], [], []>} : vector<8x32xf32>, vector<32x32xf32>, vector<8x32xf32> -> vector<8x32xf32>
    %c0_17 = arith.constant 0 : index
    %c0_18 = arith.constant 0 : index
    %30 = vector.load %arg7[%c0_17, %c0_18] : memref<1x32xf32, #tpu.memory_space<vmem>>, vector<1x32xf32>
    %31 = vector.shape_cast %30 : vector<1x32xf32> to vector<32xf32>
    %32 = vector.shape_cast %31 : vector<32xf32> to vector<1x32xf32>
    %33 = vector.broadcast %32 : vector<1x32xf32> to vector<8x32xf32>
    %34 = arith.addf %29, %33 : vector<8x32xf32>
    %c0_19 = arith.constant 0 : index
    %c0_20 = arith.constant 0 : index
    %c0_21 = arith.constant 0 : index
    %35 = vector.load %arg8[%c0_19, %c0_20, %c0_21] : memref<1x8x32xf32, #tpu.memory_space<vmem>>, vector<1x8x32xf32>
    %36 = vector.shape_cast %35 : vector<1x8x32xf32> to vector<8x32xf32>
    %37 = vector.shape_cast %34 : vector<8x32xf32> to vector<1x8x32xf32>
    tpu.vector_store %arg8[%c0_19, %c0_20, %c0_21], %37 {strides = array<i32>} : memref<1x8x32xf32, #tpu.memory_space<vmem>>, vector<1x8x32xf32>,
    return
  }
  func.func @transform_0(%arg0: i32, %arg1: i32) -> (i32, i32, i32) {
    %c0_i32 = arith.constant 0 : i32
    %c0_i32_0 = arith.constant 0 : i32
    %c0_i32_1 = arith.constant 0 : i32
    return %arg0, %c0_i32, %c0_i32_0 : i32, i32, i32
  }
  func.func @transform_1(%arg0: i32, %arg1: i32) -> (i32, i32) {
    %c0_i32 = arith.constant 0 : i32
    %c0_i32_0 = arith.constant 0 : i32
    %c0_i32_1 = arith.constant 0 : i32
    return %c0_i32, %c0_i32_0 : i32, i32
  }
  func.func @transform_2(%arg0: i32, %arg1: i32) -> (i32, i32) {
    %c0_i32 = arith.constant 0 : i32
    %c0_i32_0 = arith.constant 0 : i32
    %c0_i32_1 = arith.constant 0 : i32
    return %c0_i32, %c0_i32_0 : i32, i32
  }
  func.func @transform_3(%arg0: i32, %arg1: i32) -> (i32, i32) {
    %c0_i32 = arith.constant 0 : i32
    %c0_i32_0 = arith.constant 0 : i32
    %c0_i32_1 = arith.constant 0 : i32
    return %c0_i32, %c0_i32_0 : i32, i32
  }
  func.func @transform_4(%arg0: i32, %arg1: i32) -> (i32, i32) {
    %c0_i32 = arith.constant 0 : i32
    %c0_i32_0 = arith.constant 0 : i32
    %c0_i32_1 = arith.constant 0 : i32
    return %c0_i32, %c0_i32_0 : i32, i32
  }
  func.func @transform_5(%arg0: i32, %arg1: i32) -> (i32, i32) {
    %c0_i32 = arith.constant 0 : i32
    %c0_i32_0 = arith.constant 0 : i32
    %c0_i32_1 = arith.constant 0 : i32
    return %c0_i32, %c0_i32_0 : i32, i32
  }
  func.func @transform_6(%arg0: i32, %arg1: i32) -> (i32, i32, i32) {
    %c0_i32 = arith.constant 0 : i32
    %c0_i32_0 = arith.constant 0 : i32
    return %arg0, %arg1, %c0_i32 : i32, i32, i32
  }
}

module attributes {stable_mosaic.version = 11 : i64} {
  func.func @_mha_kernel(%arg0: i32, %arg1: i32, %arg2: memref<1x16x32xf32, #tpu.memory_space<vmem>>, %arg3: memref<32x32xf32, #tpu.memory_space<vmem>>, %arg4: memref<32x32xf32, #tpu.memory_space<vmem>>, %arg5: memref<32x32xf32, #tpu.memory_space<vmem>>, %arg6: memref<32x32xf32, #tpu.memory_space<vmem>>, %arg7: memref<1x32xf32, #tpu.memory_space<vmem>>, %arg8: memref<1x8x32xf32, #tpu.memory_space<vmem>>, %arg9: memref<4x16x8xf32, #tpu.memory_space<vmem>>, %arg10: memref<4x16x8xf32, #tpu.memory_space<vmem>>) attributes {dimension_semantics = [#tpu.dimension_semantics<parallel>, #tpu.dimension_semantics<arbitrary>], iteration_bounds = array<i64: 2, 2>, scalar_prefetch = 0 : i64, scratch_operands = 2 : i64, tpu.core_type = #tpu.core_type<tc>, window_params = [{transform_indices = @transform_0, window_bounds = array<i64: 1, 16, 32>}, {pipeline_mode = #tpu.pipeline_mode<synchronous>, transform_indices = @transform_1, window_bounds = array<i64: 32, 32>}, {pipeline_mode = #tpu.pipeline_mode<synchronous>, transform_indices = @transform_2, window_bounds = array<i64: 32, 32>}, {pipeline_mode = #tpu.pipeline_mode<synchronous>, transform_indices = @transform_3, window_bounds = array<i64: 32, 32>}, {pipeline_mode = #tpu.pipeline_mode<synchronous>, transform_indices = @transform_4, window_bounds = array<i64: 32, 32>}, {pipeline_mode = #tpu.pipeline_mode<synchronous>, transform_indices = @transform_5, window_bounds = array<i64: 1, 32>}, {transform_indices = @transform_6, window_bounds = array<i64: 1, 8, 32>}]} {
    %c0_i32 = arith.constant 0 : i32
    %0 = arith.cmpi eq, %arg1, %c0_i32 : i32
    %1 = arith.extui %0 : i1 to i32
    %c0_i32_0 = arith.constant 0 : i32
    %2 = arith.cmpi ne, %1, %c0_i32_0 : i32
    scf.if %2 {
      %c0_22 = arith.constant 0 : index
      %c0_23 = arith.constant 0 : index
      %c0_24 = arith.constant 0 : index
      %38 = vector.load %arg2[%c0_22, %c0_23, %c0_24] : memref<1x16x32xf32, #tpu.memory_space<vmem>>, vector<1x16x32xf32>
      %39 = vector.shape_cast %38 : vector<1x16x32xf32> to vector<16x32xf32>
      %c0_25 = arith.constant 0 : index
      %c0_26 = arith.constant 0 : index
      %40 = vector.load %arg4[%c0_25, %c0_26] : memref<32x32xf32, #tpu.memory_space<vmem>>, vector<32x32xf32>
      %cst_27 = arith.constant dense<0.000000e+00> : vector<16x32xf32>
      %41 = tpu.matmul %39, %40, %cst_27 {dimension_numbers = #tpu.dot_dimension_numbers<[1], [0], [0], [1], [0, 0, 1, 1], [], []>} : vector<16x32xf32>, vector<32x32xf32>, vector<16x32xf32> -> vector<16x32xf32>
      %c0_28 = arith.constant 0 : index
      %c0_29 = arith.constant 0 : index
      %42 = vector.load %arg5[%c0_28, %c0_29] : memref<32x32xf32, #tpu.memory_space<vmem>>, vector<32x32xf32>
      %cst_30 = arith.constant dense<0.000000e+00> : vector<16x32xf32>
      %43 = tpu.matmul %39, %42, %cst_30 {dimension_numbers = #tpu.dot_dimension_numbers<[1], [0], [0], [1], [0, 0, 1, 1], [], []>} : vector<16x32xf32>, vector<32x32xf32>, vector<16x32xf32> -> vector<16x32xf32>
      %44 = vector.shape_cast %41 : vector<16x32xf32> to vector<16x4x8xf32>
      %45 = tpu.transpose %44, [1, 0, 2] : vector<16x4x8xf32> -> vector<4x16x8xf32>
      %c0_31 = arith.constant 0 : index
      %c0_32 = arith.constant 0 : index
      %c0_33 = arith.constant 0 : index
      %46 = vector.load %arg9[%c0_31, %c0_32, %c0_33] : memref<4x16x8xf32, #tpu.memory_space<vmem>>, vector<4x16x8xf32>
      tpu.vector_store %arg9[%c0_31, %c0_32, %c0_33], %45 {strides = array<i32>} : memref<4x16x8xf32, #tpu.memory_space<vmem>>, vector<4x16x8xf32>,
      %47 = vector.shape_cast %43 : vector<16x32xf32> to vector<16x4x8xf32>
      %48 = tpu.transpose %47, [1, 0, 2] : vector<16x4x8xf32> -> vector<4x16x8xf32>
      %c0_34 = arith.constant 0 : index
      %c0_35 = arith.constant 0 : index
      %c0_36 = arith.constant 0 : index
      %49 = vector.load %arg10[%c0_34, %c0_35, %c0_36] : memref<4x16x8xf32, #tpu.memory_space<vmem>>, vector<4x16x8xf32>
      tpu.vector_store %arg10[%c0_34, %c0_35, %c0_36], %48 {strides = array<i32>} : memref<4x16x8xf32, #tpu.memory_space<vmem>>, vector<4x16x8xf32>,
    } else {
    }
    %c8_i32 = arith.constant 8 : i32
    %3 = arith.muli %arg1, %c8_i32 : i32
    %4 = tpu.assume_multiple %3, 8 : i32
    %c0 = arith.constant 0 : index
    %5 = arith.index_cast %4 : i32 to index
    %c0_1 = arith.constant 0 : index
    %6 = vector.load %arg2[%c0, %5, %c0_1] : memref<1x16x32xf32, #tpu.memory_space<vmem>>, vector<1x8x32xf32>
    %7 = vector.shape_cast %6 : vector<1x8x32xf32> to vector<8x32xf32>
    %c0_2 = arith.constant 0 : index
    %c0_3 = arith.constant 0 : index
    %8 = vector.load %arg3[%c0_2, %c0_3] : memref<32x32xf32, #tpu.memory_space<vmem>>, vector<32x32xf32>
    %cst = arith.constant dense<0.000000e+00> : vector<8x32xf32>
    %9 = tpu.matmul %7, %8, %cst {dimension_numbers = #tpu.dot_dimension_numbers<[1], [0], [0], [1], [0, 0, 1, 1], [], []>} : vector<8x32xf32>, vector<32x32xf32>, vector<8x32xf32> -> vector<8x32xf32>
    %10 = vector.shape_cast %9 : vector<8x32xf32> to vector<8x4x8xf32>
    %11 = tpu.transpose %10, [1, 0, 2] : vector<8x4x8xf32> -> vector<4x8x8xf32>
    %c0_4 = arith.constant 0 : index
    %c0_5 = arith.constant 0 : index
    %c0_6 = arith.constant 0 : index
    %12 = vector.load %arg9[%c0_4, %c0_5, %c0_6] : memref<4x16x8xf32, #tpu.memory_space<vmem>>, vector<4x16x8xf32>
    "tpu.trace_start"() <{level = 10 : i32, message = "hqd,hkd->hqk"}> : () -> ()
    %cst_7 = arith.constant dense<0.000000e+00> : vector<4x8x16xf32>
    %13 = tpu.matmul %11, %12, %cst_7 {dimension_numbers = #tpu.dot_dimension_numbers<[2], [2], [1], [1], [0, 0, 0, 1, 1, 1], [0], [0]>} : vector<4x8x8xf32>, vector<4x16x8xf32>, vector<4x8x16xf32> -> vector<4x8x16xf32>
    "tpu.trace_stop"() : () -> ()
    %cst_8 = arith.constant dense<0xFF800000> : vector<4x8xf32>
    %14 = vector.multi_reduction <maximumf>, %13, %cst_8 [2] : vector<4x8x16xf32> to vector<4x8xf32>
    %15 = vector.shape_cast %14 : vector<4x8xf32> to vector<4x8x1xf32>
    %16 = vector.broadcast %15 : vector<4x8x1xf32> to vector<4x8x16xf32>
    %17 = arith.subf %13, %16 : vector<4x8x16xf32>
    %18 = math.exp %17 : vector<4x8x16xf32>
    %cst_9 = arith.constant dense<0.000000e+00> : vector<4x8xf32>
    %19 = vector.multi_reduction <add>, %18, %cst_9 [2] : vector<4x8x16xf32> to vector<4x8xf32>
    %20 = vector.shape_cast %19 : vector<4x8xf32> to vector<4x8x1xf32>
    %21 = tpu.reciprocal %20 {approx = true} : vector<4x8x1xf32> -> vector<4x8x1xf32>
    %22 = vector.broadcast %21 : vector<4x8x1xf32> to vector<4x8x16xf32>
    %23 = arith.mulf %18, %22 : vector<4x8x16xf32>
    %c0_10 = arith.constant 0 : index
    %c0_11 = arith.constant 0 : index
    %c0_12 = arith.constant 0 : index
    %24 = vector.load %arg10[%c0_10, %c0_11, %c0_12] : memref<4x16x8xf32, #tpu.memory_space<vmem>>, vector<4x16x8xf32>
    "tpu.trace_start"() <{level = 10 : i32, message = "hqk,hkd->hqd"}> : () -> ()
    %cst_13 = arith.constant dense<0.000000e+00> : vector<4x8x8xf32>
    %25 = tpu.matmul %23, %24, %cst_13 {dimension_numbers = #tpu.dot_dimension_numbers<[2], [1], [1], [2], [0, 0, 0, 1, 1, 2], [0], [0]>} : vector<4x8x16xf32>, vector<4x16x8xf32>, vector<4x8x8xf32> -> vector<4x8x8xf32>
    "tpu.trace_stop"() : () -> ()
    %26 = tpu.transpose %25, [1, 0, 2] : vector<4x8x8xf32> -> vector<8x4x8xf32>
    %27 = vector.shape_cast %26 : vector<8x4x8xf32> to vector<8x32xf32>
    %c0_14 = arith.constant 0 : index
    %c0_15 = arith.constant 0 : index
    %28 = vector.load %arg6[%c0_14, %c0_15] : memref<32x32xf32, #tpu.memory_space<vmem>>, vector<32x32xf32>
    %cst_16 = arith.constant dense<0.000000e+00> : vector<8x32xf32>
    %29 = tpu.matmul %27, %28, %cst_16 {dimension_numbers = #tpu.dot_dimension_numbers<[1], [0], [0], [1], [0, 0, 1, 1], [], []>} : vector<8x32xf32>, vector<32x32xf32>, vector<8x32xf32> -> vector<8x32xf32>
    %c0_17 = arith.constant 0 : index
    %c0_18 = arith.constant 0 : index
    %30 = vector.load %arg7[%c0_17, %c0_18] : memref<1x32xf32, #tpu.memory_space<vmem>>, vector<1x32xf32>
    %31 = vector.shape_cast %30 : vector<1x32xf32> to vector<32xf32>
    %32 = vector.shape_cast %31 : vector<32xf32> to vector<1x32xf32>
    %33 = vector.broadcast %32 : vector<1x32xf32> to vector<8x32xf32>
    %34 = arith.addf %29, %33 : vector<8x32xf32>
    %c0_19 = arith.constant 0 : index
    %c0_20 = arith.constant 0 : index
    %c0_21 = arith.constant 0 : index
    %35 = vector.load %arg8[%c0_19, %c0_20, %c0_21] : memref<1x8x32xf32, #tpu.memory_space<vmem>>, vector<1x8x32xf32>
    %36 = vector.shape_cast %35 : vector<1x8x32xf32> to vector<8x32xf32>
    %37 = vector.shape_cast %34 : vector<8x32xf32> to vector<1x8x32xf32>
    tpu.vector_store %arg8[%c0_19, %c0_20, %c0_21], %37 {strides = array<i32>} : memref<1x8x32xf32, #tpu.memory_space<vmem>>, vector<1x8x32xf32>,
    return
  }
  func.func @transform_0(%arg0: i32, %arg1: i32) -> (i32, i32, i32) {
    %c0_i32 = arith.constant 0 : i32
    %c0_i32_0 = arith.constant 0 : i32
    %c0_i32_1 = arith.constant 0 : i32
    return %arg0, %c0_i32, %c0_i32_0 : i32, i32, i32
  }
  func.func @transform_1(%arg0: i32, %arg1: i32) -> (i32, i32) {
    %c0_i32 = arith.constant 0 : i32
    %c0_i32_0 = arith.constant 0 : i32
    %c0_i32_1 = arith.constant 0 : i32
    return %c0_i32, %c0_i32_0 : i32, i32
  }
  func.func @transform_2(%arg0: i32, %arg1: i32) -> (i32, i32) {
    %c0_i32 = arith.constant 0 : i32
    %c0_i32_0 = arith.constant 0 : i32
    %c0_i32_1 = arith.constant 0 : i32
    return %c0_i32, %c0_i32_0 : i32, i32
  }
  func.func @transform_3(%arg0: i32, %arg1: i32) -> (i32, i32) {
    %c0_i32 = arith.constant 0 : i32
    %c0_i32_0 = arith.constant 0 : i32
    %c0_i32_1 = arith.constant 0 : i32
    return %c0_i32, %c0_i32_0 : i32, i32
  }
  func.func @transform_4(%arg0: i32, %arg1: i32) -> (i32, i32) {
    %c0_i32 = arith.constant 0 : i32
    %c0_i32_0 = arith.constant 0 : i32
    %c0_i32_1 = arith.constant 0 : i32
    return %c0_i32, %c0_i32_0 : i32, i32
  }
  func.func @transform_5(%arg0: i32, %arg1: i32) -> (i32, i32) {
    %c0_i32 = arith.constant 0 : i32
    %c0_i32_0 = arith.constant 0 : i32
    %c0_i32_1 = arith.constant 0 : i32
    return %c0_i32, %c0_i32_0 : i32, i32
  }
  func.func @transform_6(%arg0: i32, %arg1: i32) -> (i32, i32, i32) {
    %c0_i32 = arith.constant 0 : i32
    %c0_i32_0 = arith.constant 0 : i32
    return %arg0, %arg1, %c0_i32 : i32, i32, i32
  }
}

</mosaic_0001>

<bundles_post_ra>
// kernel: tpu_custom_call.1
= control target key start
LH: loop header
LB: loop body
LE: loop exit
PB: predicated region body
PF: predicated region fallthrough
CT: control target
= control target key end

     0   :  { %s2802_s0 = inlined_call_operand.hbm [shape: f32[2,16,32], index: 0, kind: input, shape index: {}]   ;;  %s2803_s1 = inlined_call_operand.hbm [shape: f32[32,32], index: 1, kind: input, shape index: {}]   ;;  %s2804_s2 = inlined_call_operand.hbm [shape: f32[32,32], index: 2, kind: input, shape index: {}]   ;;  %s2805_s3 = inlined_call_operand.hbm [shape: f32[32,32], index: 3, kind: input, shape index: {}]   ;;  %s2806_s4 = inlined_call_operand.hbm [shape: f32[32,32], index: 4, kind: input, shape index: {}]   ;;  %s2807_s5 = inlined_call_operand.vmem [shape: f32[1,32], index: 5, kind: input, shape index: {}]   ;;  %s2808_s6 = inlined_call_operand.hbm [shape: f32[2,16,32], index: 6, kind: output, shape index: {}]  }
   0x1   :  { %2817 = sst [smem:[#allocation23_spill]] %s2803_s1 }
   0x2   :  { %2818 = sst [smem:[#allocation24_spill]] %s2804_s2 }
   0x3   :  { %2819 = sst [smem:[#allocation25_spill]] %s2805_s3 }
   0x4   :  { %2820 = sst [smem:[#allocation26_spill]] %s2806_s4 }
   0x5   :  { %2821 = sst [smem:[#allocation27_spill]] %s2807_s5 }
   0x6   :  { %2822 = sst [smem:[#allocation28_spill]] %s2808_s6 }
   0x7   :  { %11 = vsyncpa [#allocation5], 0 }
   0x8   :  { %13 = vsyncpa [#allocation5 + $0x1], 0 }
   0x9   :  { %14 = vsyncpa [#allocation8], 0 }
   0xa   :  { %15 = vsyncpa [#allocation11], 0 }
   0xb   :  { %16 = vsyncpa [#allocation6], 0 }
   0xc   :  { %18 = vsyncpa [#allocation6 + $0x1], 0  ;;  %s2205_s21 = smov 0   ;;  %s2207_s22 = smov 0  }
   0xd   :  { %s2209_s23 = smov 0   ;;  %s2211_s24 = smov 0  }
   0xe   :  { %s2213_s25 = smov 0   ;;  %s2215_s26 = smov 0  }
   0xf   :  { %s2217_s27 = smov 0   ;;  %s2219_s28 = smov 0  }
  0x10   :  { %s2221_s29 = smov 0   ;;  %s2223_s30 = smov 0  }
  0x11   :  { %s2225_s7 = smov 0  }
  0x12 LB: > { %2823 = sst [smem:[#allocation18_spill]] %s2109_s21  ;;  %s1638_s8 = sadd.s32 4294967295, %s2149_s7   ;;  %s2149_s7 = sphi %s2225_s7, %s24_s7   ;;  %s2145_s30 = sphi %s2223_s30, %s2855_s30   ;;  %s2141_s29 = sphi %s2221_s29, %s2846_s29   ;;  %s2137_s28 = sphi %s2219_s28, %s2854_s28   ;;  %s2133_s27 = sphi %s2217_s27, %s2845_s27   ;;  %s2129_s26 = sphi %s2215_s26, %s2853_s26   ;;  %s2125_s25 = sphi %s2213_s25, %s2852_s25   ;;  %s2121_s24 = sphi %s2211_s24, %s2851_s24   ;;  %s2117_s23 = sphi %s2209_s23, %s2850_s23   ;;  %s2113_s22 = sphi %s2207_s22, %s2849_s22   ;;  %s2109_s21 = sphi %s2205_s21, %s2848_s21  }
  0x13   : > { %2824 = sst [smem:[#allocation19_spill]] %s2141_s29  ;;  %s1639_s9 = sadd.s32 4294967294, %s2149_s7  }
  0x14   : > { %p56_p0 = scmp.ne.s32.totalorder %s2125_s25, %s2121_s24  ;;  %p2261_p1 = scmp.eq.s32.totalorder %s1638_s8, 0 }
  0x15   : > { %p186_p2 = scmp.ne.s32.totalorder %s2117_s23, %s2113_s22  ;;  %p187_p3 = scmp.eq.s32.totalorder %s1638_s8, 3 }
  0x16   : > { %p2269_p4 = por %p2261_p1, %p56_p0  ;;  %p192_p5 = scmp.ne.s32.totalorder %s2113_s22, %s2109_s21 }
  0x17   : > { %p2275_p6 = por %p187_p3, %p186_p2  ;;  %p193_p7 = scmp.eq.s32.totalorder %s1639_s9, 3 }
  0x18   : > { %p1640_p8 = scmp.ge.s32.totalorder %s2149_s7, 1  ;;  %p200_p9 = scmp.lt.s32.totalorder %s2149_s7, 5 }
  0x19   : > { %p2281_p10 = por %p193_p7, %p192_p5  ;;  %s2831_s1 = sld [smem:[#allocation23_spill]] }
  0x1a   : > { %p2285_p11 = pnand %p1640_p8, %p200_p9  ;;  %s2151_s18 = smov [#allocation7]  }
  0x1b   : > { %s2828_s13 = scalar_select %p2281_p10, 1, 0 }
  0x1c   : > { %p1714_p12 = pneg %p2285_p11  ;;  %s213_s19 = sshll.u32 %s2151_s18, 4  ;;  %s214_s19 = int_to_ptr.vmem [resolvable:$true] %s213_s19 }
  0x1d   : > { %2829 = sst [smem:[#allocation20_spill]] %s2828_s13  ;;  %s2811_s15 = smov 128  }
  0x1e   : > { %p2296_p13 = pnand %p1714_p12, %p2261_p1  ;;  %s2833_s3 = sld [smem:[#allocation25_spill]] }
  0x1f   : > { %s211_s17 = sshll.u32 %s2831_s1, 4  ;;  %s2812_s16 = smov 8   ;;  %s212_s17 = int_to_ptr.hbm [resolvable:$true] %s211_s17 }
  0x20   : > { %1717 = dma.hbm_to_vmem [thread:$0]  (!%p2296_p13), %s212_s17, 512, %s214_s19, [#allocation8], %s2811_s15, %s2811_s15, %s2812_s16  }
  0x21   : > { %s2834_s2 = sld [smem:[#allocation24_spill]]  ;;  %s2154_s21 = smov [#allocation10]  }
  0x22   : > { %s241_s24 = sshll.u32 %s2154_s21, 4  ;;  %s2155_s17 = smov [#allocation9]   ;;  %s242_s24 = int_to_ptr.vmem [resolvable:$true] %s241_s24 }
  0x23   : > { %s227_s19 = sshll.u32 %s2155_s17, 4  ;;  %s2835_s4 = sld [smem:[#allocation26_spill]]  ;;  %s228_s19 = int_to_ptr.vmem [resolvable:$true] %s227_s19 }
  0x24   : > { %s239_s9 = sshll.u32 %s2833_s3, 4  ;;  %s2156_s21 = smov [#allocation12]   ;;  %s240_s9 = int_to_ptr.hbm [resolvable:$true] %s239_s9 }
  0x25   : > { %1723 = dma.hbm_to_vmem [thread:$0]  (!%p2296_p13), %s240_s9, 512, %s242_s24, [#allocation11], %s2811_s15, %s2811_s15, %s2812_s16  }
  0x26   : > { %s255_s9 = sshll.u32 %s2156_s21, 4  ;;  %s33_s24 = sadd.s32 1, %s2141_s29  ;;  %s256_s9 = int_to_ptr.vmem [resolvable:$true] %s255_s9 }
  0x27   : > { %s225_s13 = sshll.u32 %s2834_s2, 4  ;;  %p34_p0 = scmp.ge.s32.totalorder %s33_s24, 2  ;;  %s226_s13 = int_to_ptr.hbm [resolvable:$true] %s225_s13 }
  0x28   : > { %1720 = dma.hbm_to_vmem [thread:$0]  (!%p2296_p13), %s226_s13, 512, %s228_s19, [#allocation8], %s2811_s15, %s2811_s15, %s2812_s16  }
  0x29   : > { %s253_s18 = sshll.u32 %s2835_s4, 4  ;;  %s36_s17 = sadd.s32 1, %s2145_s30  ;;  %s254_s18 = int_to_ptr.hbm [resolvable:$true] %s253_s18 }
  0x2a   : > { %1726 = dma.hbm_to_vmem [thread:$0]  (!%p2296_p13), %s254_s18, 512, %s256_s9, [#allocation11], %s2811_s15, %s2811_s15, %s2812_s16  }
  0x2b   : > { %p50_p2 = scmp.ne.s32.totalorder %s2129_s26, %s2125_s25  ;;  %s2857_s24 = smov (%p34_p0, %s33_s24), 0 }
  0x2c   : > { %2836 = sst [smem:[#allocation21_spill]] %s2857_s24  ;;  %s2859_s17 = smov (!%p34_p0, %s36_s17), %s2145_s30 }
  0x2d   : > { %s43_s13 = sadd.s32 1, %s2129_s26  ;;  %p51_p3 = scmp.eq.s32.totalorder %s2149_s7, 0 }
  0x2e   : > { %p38_p5 = scmp.ge.s32.totalorder %s2859_s17, 2  ;;  %s172_s20 = ssub.s32 %s2141_s29, %s2857_s24 }
  0x2f   : > { %p2340_p7 = por %p51_p3, %p50_p2  ;;  %s176_s1 = sadd.s32 1, %s2117_s23 }
  0x30   : > { %s2861_s17 = smov (%p38_p5, %s2859_s17), 0  ;;  %p1739_p8 = scmp.lt.s32.totalorder %s2149_s7, 4 }
  0x31   : > { %2838 = sst [smem:[#allocation22_spill]] %s2861_s17  ;;  %s272_s8 = sand.u32 1, %s2129_s26  }
  0x32   : > { %s40_s18 = ssub.s32 %s2145_s30, %s2861_s17  ;;  %s1685_s21 = sshll.u32 %s2145_s30, 4 }
  0x33   : > { %p41_p9 = scmp.eq.s32.totalorder %s40_s18, 0  ;;  %s173_s9 = sor.u32 %s172_s20, %s40_s18 }
  0x34   : > { %p174_p12 = scmp.eq.s32.totalorder %s173_s9, 0  ;;  %s1646_s15 = sshll.u32 %s272_s8, 4 }
  0x35   : > { %s2353_s16 = scalar_select %p41_p9, %s2129_s26, %s43_s13  }
  0x36   : > { %s2356_s2 = scalar_select %p174_p12, %s2117_s23, %s176_s1  }
  0x37   : > { %s281_s24 = scalar_lea.hbm %s2802_s0, %s1685_s21  ;;  %s276_s5 = scalar_lea.vmem [#allocation4], %s1646_s15 }
  0x38   : > { %s282_s29 = sshll.u32 %s281_s24, 4  ;;  %s284_s6 = sshll.u32 %s276_s5, 4  ;;  %s283_s29 = int_to_ptr.hbm [resolvable:$true] %s282_s29  ;;  %s285_s6 = int_to_ptr.vmem [resolvable:$true] %s284_s6 }
  0x39   : > { %p1728_p13 = pnand %p1739_p8, %p2340_p7  ;;  %s273_s17 = scalar_lea.sflag [#allocation5], %s272_s8 }
  0x3a   : > { %s2839_s20 = smov 8   ;;  %s2840_s18 = smov 128  }
  0x3b   : > { %1730 = dma.hbm_to_vmem [thread:$0]  (!%p1728_p13), %s283_s29, 256, %s285_s6, %s273_s17, %s2840_s18, %s2840_s18, %s2839_s20  }
  0x3c   : > { %296 = sbr.rel (%p2285_p11) target bundleno = 1497 (0x5d9), region = 44  ;;  %s298_s3 = sand.u32 (!%p2285_p11), 1, %s2125_s25  }
  0x3d   : > { %s1650_s4 = sshll.u32 (!%p2285_p11), %s298_s3, 4  ;;  %s299_s24 = scalar_lea.sflag (!%p2285_p11), [#allocation5], %s298_s3 }
  0x3e   : > { %s2371_s15 = scalar_lea.vmem (!%p2285_p11), [#allocation4], %s1650_s4 }
  0x41   : > { %2092 = dma.done.wait (%p2269_p4), %s299_s24, 256  }
  0x42   : > { %2094 = vsyncadd (%p2269_p4), %s299_s24, 4294967040 }
  0x43   : > { %2096 = dma.done.wait (%p2261_p1), [#allocation8], 1024  }
  0x44   : > { %2098 = vsyncadd (%p2261_p1), [#allocation8], 4294966272 }
  0x45   : > { %2100 = dma.done.wait (%p2261_p1), [#allocation11], 1024  }
  0x46   : > { %2102 = vsyncadd (%p2261_p1), [#allocation11], 4294966272  ;;  %s349_s5 = sand.u32 1, %s2113_s22   ;;  %p1656_p4 = scmp.ne.s32.totalorder %s2133_s27, 0 }
  0x47   : > { %s2388_s6 = sshll.u32 %s349_s5, 3  ;;  %s2157_s10 = smov (!%p1656_p4), 112  }
  0x48   : > { %s351_s29 = scalar_lea.vmem [#allocation13], %s2388_s6  ;;  %355 = sbr.rel (%p1656_p4) target bundleno = 401 (0x191), region = 68 }
  0x49   : > { %s2158_s11 = smov (!%p1656_p4), 120   ;;  %s2159_s14 = smov (!%p1656_p4), 104  }
  0x4d   : > { %v361_v0 = vld [vmem:[#allocation9 + $0x18] sm:$0xff]  ;;  %v360_v2 = vld [vmem:[#allocation9 + $0x10] sm:$0xff]  ;;  %v359_v4 = vld [vmem:[#allocation9 + $0x8] sm:$0xff]  ;;  %vm362_vm0 = vcmask 261120   ;;  %v2160_v16 = vmov 1983009808  }
  0x4e   : > { %v395_v1 = vld [vmem:[#allocation10 + $0x18] sm:$0xff]  ;;  %381 = vmatpush.msra.mxu0 %v361_v0  ;;  %v394_v3 = vld [vmem:[#allocation10 + $0x10] sm:$0xff]  ;;  %v393_v5 = vld [vmem:[#allocation10 + $0x8] sm:$0xff]  ;;  %1686 = vmatpush.msra.mxu2 %v361_v0  ;;  %v445_v17 = vunpack.c.l.s4 %v2160_v16  ;;  %vm440_vm1 = vcmask 1047556   ;;  %v2161_v28 = vmov 1934713408  }
  0x4f   : > { %408 = vmatpush.msra.mxu1 %v395_v1  ;;  %1690 = vmatpush.msra.mxu3 %v395_v1  ;;  %v358_v6 = vld [vmem:[#allocation9] sm:$0xff]  ;;  %v357_v9 = vld [vmem:[%s2371_s15 + $0x8] sm:$0xff]  ;;  %v469_v29 = vunpack.c.l.s4 %v2161_v28  ;;  %vm660_vm2 = vcmask 64512  }
  0x50   : > { %382 = vmatpush.msra.mxu0 %v360_v2  ;;  %v392_v7 = vld [vmem:[#allocation10] sm:$0xff]  ;;  %1687 = vmatpush.msra.mxu2 %v360_v2  ;;  %v2403_v23 = vunpack.c.0.s8 %v445_v17 }
  0x51   : > { %409 = vmatpush.msra.mxu1 %v394_v3  ;;  %1691 = vmatpush.msra.mxu3 %v394_v3  ;;  %v356_v8 = vld [vmem:[%s2371_s15] sm:$0xff]  ;;  %v2415_v41 = vunpack.c.0.s8 %v469_v29 }
  0x52   : > { %383 = vmatpush.msra.mxu0 %v359_v4  ;;  %1688 = vmatpush.msra.mxu2 %v359_v4 }
  0x53   : > { %410 = vmatpush.msra.mxu1 %v393_v5  ;;  %1692 = vmatpush.msra.mxu3 %v393_v5 }
  0x54   : > { %384 = vmatpush.msra.mxu0 %v358_v6  ;;  %1689 = vmatpush.msra.mxu2 %v358_v6 }
  0x55   : > { %411 = vmatpush.msra.mxu1 %v392_v7  ;;  %1657 = vmatmul.msk.f32.vlgmr.msra.gmra.mxu0 %vm362_vm0, %v356_v8 }
  0x56   : > { %1659 = vmatmul.msk.f32.vlgmr.msra.gmra.mxu1 %vm362_vm0, %v356_v8  ;;  %1693 = vmatpush.msra.mxu3 %v392_v7 }
  0x57   : > { %1660 = vmatmul.msk.f32.vlgmr.msra.gmra.mxu3 %vm362_vm0, %v357_v9  ;;  %1658 = vmatmul.msk.f32.vlgmr.msra.gmra.mxu2 %vm362_vm0, %v357_v9 }
  0xd2   : > { %v386_v10 = vpop.f32.mrf.mxu0 }
  0xd3   : > { %v413_v11 = vpop.f32.mrf.mxu1  ;;  %421 = vrot.lane.b32.xlu2 %v386_v10, %s2158_s11  ;;  %427 = vrot.lane.b32.xlu0 %v386_v10, %s2157_s10  ;;  %v442_v21 = vrot.slane %v386_v10, 4 }
  0xd4   : > { %677 = vrot.lane.b32.xlu1 %v413_v11, %s2157_s10  ;;  %v691_v26 = vrot.slane %v413_v11, 4 }
  0xda   : > { %v416_v12 = vpop.f32.mrf.mxu3  ;;  %v2394_v13 = vpop.f32.mrf.mxu2 }
  0xdb   : > { %671 = vrot.lane.b32.xlu2 %v413_v11, %s2158_s11  ;;  %433 = vrot.lane.b32.xlu0 %v386_v10, %s2159_s14  ;;  %v747_v30 = vrot.slane %v416_v12, 4  ;;  %v498_v44 = vrot.slane %v2394_v13, 4 }
  0xdc   : > { %679 = vrot.lane.b32.xlu1 %v416_v12, %s2157_s10 }
  0xe3   : > { %423 = vrot.lane.b32.xlu2 %v2394_v13, %s2158_s11  ;;  %429 = vrot.lane.b32.xlu0 %v2394_v13, %s2157_s10 }
  0xe4   : > { %435 = vrot.lane.b32.xlu1 %v2394_v13, %s2159_s14 }
  0xeb   : > { %685 = vrot.lane.b32.xlu2 %v416_v12, %s2159_s14  ;;  %673 = vrot.lane.b32.xlu0 %v416_v12, %s2158_s11 }
  0xec   : > { %683 = vrot.lane.b32.xlu1 %v413_v11, %s2159_s14 }
 0x12d   : > { %v422_v14 = vpop.permute.xlu2 %421 }
 0x12e   : > { %v454_v33 = vrot.slane %v422_v14, 4 }
 0x135   : > { %v2399_v15 = vpop.permute.xlu2 %671 }
 0x136   : > { %v703_v49 = vrot.slane %v2399_v15, 4 }
 0x13d   : > { %v2401_v19 = vpop.permute.xlu2 %423 }
 0x13e   : > { %v510_v57 = vrot.slane %v2401_v19, 4 }
 0x145   : > { %v428_v20 = vpop.permute.xlu0 %427  ;;  %v2422_v46 = vpop.permute.xlu2 %685 }
 0x146   : > { %v678_v18 = vpop.permute.xlu1 %677  ;;  %v439_v22 = vrot.slane %v428_v20, 4  ;;  %v443_v25 = vsel %vm440_vm1, %v428_v20, %v442_v21  ;;  %v757_v59 = vrot.slane %v2422_v46, 4 }
 0x147   : > { %v689_v24 = vrot.slane %v678_v18, 4  ;;  %v692_v31 = vsel %vm440_vm1, %v678_v18, %v691_v26  ;;  %v451_v32 = vperm.slane %v443_v25, %v2403_v23 }
 0x148   : > { %v441_v27 = vsel %vm440_vm1, %v439_v22, %v386_v10  ;;  %v2413_v40 = vperm.slane %v692_v31, %v2403_v23 }
 0x149   : > { %v690_v34 = vsel %vm440_vm1, %v689_v24, %v413_v11  ;;  %v447_v35 = vperm.slane %v441_v27, %v2403_v23  ;;  %v478_v47 = vrot.slane %v451_v32, 4 }
 0x14a   : > { %v2420_v45 = vperm.slane %v690_v34, %v2403_v23  ;;  %v727_v58 = vrot.slane %v2413_v40, 4 }
 0x14b   : > { %v466_v50 = vrot.slane %v447_v35, 4 }
 0x14c   : > { %v715_v61 = vrot.slane %v2420_v45, 4 }
 0x14d   : > { %v434_v39 = vpop.permute.xlu0 %433 }
 0x14e   : > { %v680_v36 = vpop.permute.xlu1 %679  ;;  %v452_v42 = vrot.slane %v434_v39, 4  ;;  %v455_v43 = vsel %vm440_vm1, %v434_v39, %v454_v33 }
 0x14f   : > { %v745_v37 = vrot.slane %v680_v36, 4  ;;  %v748_v38 = vsel %vm440_vm1, %v680_v36, %v747_v30  ;;  %v463_v48 = vperm.slane %v455_v43, %v2403_v23 }
 0x150   : > { %v2427_v51 = vperm.slane %v748_v38, %v2403_v23  ;;  %v453_v52 = vsel %vm440_vm1, %v452_v42, %v422_v14 }
 0x151   : > { %v746_v53 = vsel %vm440_vm1, %v745_v37, %v416_v12  ;;  %v459_v54 = vperm.slane %v453_v52, %v2403_v23  ;;  %v476_v55 = vrot.slane %v463_v48, 4  ;;  %v479_v56 = vsel %vm440_vm1, %v463_v48, %v478_v47 }
 0x152   : > { %v487_v60 = vperm.slane %v479_v56, %v2415_v41  ;;  %v2441_v1 = vperm.slane %v746_v53, %v2403_v23  ;;  %v783_v6 = vrot.slane %v2427_v51, 4 }
 0x153   : > { %v464_v62 = vrot.slane %v459_v54, 4  ;;  %v467_v63 = vsel %vm440_vm1, %v459_v54, %v466_v50  ;;  %v477_v0 = vsel %vm440_vm1, %v476_v55, %v451_v32 }
 0x154   : > { %v475_v2 = vperm.slane %v467_v63, %v2415_v41  ;;  %v483_v3 = vperm.slane %v477_v0, %v2415_v41  ;;  %v494_v4 = vrot.slane %v487_v60, 4 }
 0x155   : > { %v465_v7 = vsel %vm440_vm1, %v464_v62, %v447_v35  ;;  %v430_v26 = vpop.permute.xlu0 %429 }
 0x156   : > { %v436_v5 = vpop.permute.xlu1 %435  ;;  %v471_v10 = vperm.slane %v465_v7, %v2415_v41  ;;  %v490_v11 = vrot.slane %v475_v2, 4  ;;  %v492_v12 = vrot.slane %v483_v3, 4  ;;  %v495_v14 = vsel %vm440_vm1, 0.0, %v494_v4 }
 0x157   : > { %v508_v8 = vrot.slane %v436_v5, 4  ;;  %v511_v9 = vsel %vm440_vm1, %v436_v5, %v510_v57  ;;  %v563_v16 = vsel %vm440_vm1, %v494_v4, %v483_v3  ;;  %v568_v17 = vrot.slane %v495_v14, 4 }
 0x158   : > { %v519_v20 = vperm.slane %v511_v9, %v2403_v23  ;;  %v488_v21 = vrot.slane %v471_v10, 4  ;;  %v491_v22 = vsel %vm440_vm1, 0.0, %v490_v11  ;;  %v493_v24 = vsel %vm440_vm1, 0.0, %v492_v12 }
 0x159   : > { %v509_v18 = vsel %vm440_vm1, %v508_v8, %v2401_v19  ;;  %v552_v25 = vsel %vm440_vm1, %v490_v11, %v471_v10  ;;  %v557_v28 = vrot.slane %v491_v22, 4  ;;  %v567_v29 = vperm.slane %v563_v16, %v2403_v23 }
 0x15a   : > { %v556_v27 = vperm.slane %v552_v25, %v2403_v23  ;;  %v569_v30 = vsel %vm440_vm1, %v568_v17, %v493_v24  ;;  %v489_v19 = vsel %vm440_vm1, 0.0, %v488_v21  ;;  %v515_v32 = vperm.slane %v509_v18, %v2403_v23 }
 0x15b   : > { %v573_v31 = vperm.slane %v569_v30, %v2403_v23  ;;  %v532_v33 = vrot.slane %v519_v20, 4  ;;  %v558_v34 = vsel %vm440_vm1, %v557_v28, %v489_v19  ;;  %v588_v36 = vrot.slane %v567_v29, 4 }
 0x15c   : > { %v576_v35 = vrot.slane %v556_v27, 4  ;;  %v496_v37 = vrot.slane %v430_v26, 4  ;;  %v562_v38 = vperm.slane %v558_v34, %v2403_v23  ;;  %v520_v42 = vrot.slane %v515_v32, 4 }
 0x15d   : > { %v586_v39 = vrot.slane %v573_v31, 4  ;;  %v499_v43 = vsel %vm440_vm1, %v430_v26, %v498_v44  ;;  %v589_v48 = vsel %vm440_vm1, %v573_v31, %v588_v36  ;;  %v2492_v26 = vpop.permute.xlu0 %673 }
 0x15e   : > { %v684_v47 = vpop.permute.xlu1 %683  ;;  %v497_v50 = vsel %vm440_vm1, %v496_v37, %v2394_v13  ;;  %v507_v52 = vperm.slane %v499_v43, %v2403_v23  ;;  %v574_v54 = vrot.slane %v562_v38, 4  ;;  %v577_v55 = vsel %vm440_vm1, %v562_v38, %v576_v35 }
 0x15f   : > { %v701_v53 = vrot.slane %v684_v47, 4  ;;  %v587_v56 = vsel %vm440_vm1, %v586_v39, %v567_v29  ;;  %v597_v57 = vperm.slane %v589_v48, %v2415_v41  ;;  %v585_v60 = vperm.slane %v577_v55, %v2415_v41 }
 0x160   : > { %v593_v44 = vperm.slane %v587_v56, %v2415_v41  ;;  %v503_v62 = vperm.slane %v497_v50, %v2403_v23  ;;  %v533_v63 = vsel %vm440_vm1, %v532_v33, %v507_v52  ;;  %v575_v13 = vsel %vm440_vm1, %v574_v54, %v556_v27 }
 0x161   : > { %v602_v0 = vrot.slane %v597_v57, 4  ;;  %v534_v2 = vrot.slane %v507_v52, 4  ;;  %v539_v3 = vperm.slane %v533_v63, %v2415_v41  ;;  %v581_v4 = vperm.slane %v575_v13, %v2415_v41 }
 0x162   : > { %v598_v5 = vrot.slane %v593_v44, 4  ;;  %v604_v7 = vrot.slane %v585_v60, 4  ;;  %v521_v8 = vsel %vm440_vm1, %v520_v42, %v503_v62  ;;  %v522_v10 = vrot.slane %v503_v62, 4 }
 0x163   : > { %v603_v9 = vsel %vm440_vm1, %v602_v0, %v585_v60  ;;  %v527_v11 = vperm.slane %v521_v8, %v2415_v41  ;;  %v535_v12 = vsel %vm440_vm1, %v519_v20, %v534_v2  ;;  %v600_v16 = vrot.slane %v581_v4, 4 }
 0x164   : > { %v599_v14 = vsel %vm440_vm1, %v598_v5, %v581_v4  ;;  %v605_v17 = vsel %vm440_vm1, %v597_v57, %v604_v7  ;;  %665 = vst.msk [vmem:[#allocation2 + $0x20] sm:$0xff] %vm660_vm2, %v603_v9  ;;  %v543_v18 = vperm.slane %v535_v12, %v2415_v41  ;;  %v523_v21 = vsel %vm440_vm1, %v515_v32, %v522_v10 }
 0x165   : > { %661 = vst.msk [vmem:[#allocation2] sm:$0xff] %vm660_vm2, %v599_v14  ;;  %v544_v22 = vrot.slane %v527_v11, 4  ;;  %v548_v24 = vrot.slane %v539_v3, 4  ;;  %v702_v25 = vsel %vm440_vm1, %v701_v53, %v2399_v15  ;;  %v601_v20 = vsel %vm440_vm1, %v593_v44, %v600_v16 }
 0x166   : > { %667 = vst.msk [vmem:[#allocation2 + $0x30] sm:$0xff] %vm660_vm2, %v605_v17  ;;  %v531_v27 = vperm.slane %v523_v21, %v2415_v41  ;;  %v550_v28 = vrot.slane %v543_v18, 4  ;;  %v704_v29 = vsel %vm440_vm1, %v684_v47, %v703_v49  ;;  %v708_v31 = vperm.slane %v702_v25, %v2403_v23 }
 0x167   : > { %663 = vst.msk [vmem:[#allocation2 + $0x10] sm:$0xff] %vm660_vm2, %v601_v20  ;;  %v545_v30 = vsel %vm440_vm1, 0.0, %v544_v22  ;;  %v549_v19 = vsel %vm440_vm1, 0.0, %v548_v24  ;;  %v712_v32 = vperm.slane %v704_v29, %v2403_v23  ;;  %v2511_v15 = vsel %vm440_vm1, %v757_v59, %v2492_v26 }
 0x168   : > { %v546_v33 = vrot.slane %v531_v27, 4  ;;  %v551_v34 = vsel %vm440_vm1, 0.0, %v550_v28  ;;  %v617_v35 = vsel %vm440_vm1, %v550_v28, %v539_v3  ;;  %v713_v37 = vrot.slane %v708_v31, 4 }
 0x169   : > { %v621_v49 = vperm.slane %v617_v35, %v2403_v23  ;;  %v622_v36 = vrot.slane %v551_v34, 4  ;;  %v716_v38 = vsel %vm440_vm1, %v708_v31, %v715_v61  ;;  %v725_v47 = vrot.slane %v712_v32, 4 }
 0x16a   : > { %v547_v39 = vsel %vm440_vm1, 0.0, %v546_v33  ;;  %v606_v42 = vsel %vm440_vm1, %v546_v33, %v527_v11  ;;  %v724_v43 = vperm.slane %v716_v38, %v2415_v41  ;;  %v714_v54 = vsel %vm440_vm1, %v713_v37, %v2420_v45 }
 0x16b   : > { %v610_v48 = vperm.slane %v606_v42, %v2403_v23  ;;  %v611_v50 = vrot.slane %v547_v39, 4  ;;  %v623_v59 = vsel %vm440_vm1, %v622_v36, %v549_v19  ;;  %v642_v52 = vrot.slane %v621_v49, 4 }
 0x16c   : > { %v627_v53 = vperm.slane %v623_v59, %v2403_v23  ;;  %v726_v61 = vsel %vm440_vm1, %v725_v47, %v2413_v40  ;;  %v728_v55 = vsel %vm440_vm1, %v712_v32, %v727_v58  ;;  %v720_v60 = vperm.slane %v714_v54, %v2415_v41 }
 0x16d   : > { %v612_v56 = vsel %vm440_vm1, %v611_v50, %v545_v30  ;;  %v630_v57 = vrot.slane %v610_v48, 4  ;;  %v732_v44 = vperm.slane %v726_v61, %v2415_v41  ;;  %v736_v45 = vperm.slane %v728_v55, %v2415_v41 }
 0x16e   : > { %v616_v62 = vperm.slane %v612_v56, %v2403_v23  ;;  %v640_v63 = vrot.slane %v627_v53, 4  ;;  %v643_v13 = vsel %vm440_vm1, %v627_v53, %v642_v52  ;;  %v737_v2 = vrot.slane %v720_v60, 4 }
 0x16f   : > { %v651_v0 = vperm.slane %v643_v13, %v2415_v41  ;;  %v739_v40 = vrot.slane %v724_v43, 4  ;;  %v741_v3 = vrot.slane %v732_v44, 4  ;;  %v743_v7 = vrot.slane %v736_v45, 4 }
 0x170   : > { %v628_v58 = vrot.slane %v616_v62, 4  ;;  %v631_v4 = vsel %vm440_vm1, %v616_v62, %v630_v57  ;;  %v641_v5 = vsel %vm440_vm1, %v640_v63, %v621_v49  ;;  %v738_v11 = vsel %vm440_vm1, 0.0, %v737_v2 }
 0x171   : > { %v639_v8 = vperm.slane %v631_v4, %v2415_v41  ;;  %v647_v9 = vperm.slane %v641_v5, %v2415_v41  ;;  %v656_v10 = vrot.slane %v651_v0, 4  ;;  %v740_v14 = vsel %vm440_vm1, 0.0, %v739_v40 }
 0x172   : > { %v629_v12 = vsel %vm440_vm1, %v628_v58, %v610_v48  ;;  %v742_v16 = vsel %vm440_vm1, 0.0, %v741_v3  ;;  %v744_v17 = vsel %vm440_vm1, 0.0, %v743_v7  ;;  %v801_v25 = vsel %vm440_vm1, %v739_v40, %v720_v60 }
 0x173   : > { %v635_v18 = vperm.slane %v629_v12, %v2415_v41  ;;  %v652_v21 = vrot.slane %v647_v9, 4  ;;  %v657_v22 = vsel %vm440_vm1, %v656_v10, %v639_v8  ;;  %v658_v24 = vrot.slane %v639_v8, 4 }
 0x174   : > { %666 = vst.msk [vmem:[#allocation2 + $0x28] sm:$0xff] %vm660_vm2, %v657_v22  ;;  %v806_v20 = vrot.slane %v740_v14, 4  ;;  %v812_v27 = vsel %vm440_vm1, %v743_v7, %v732_v44  ;;  %v817_v28 = vrot.slane %v744_v17, 4  ;;  %v805_v31 = vperm.slane %v801_v25, %v2403_v23 }
 0x175   : > { %v653_v29 = vsel %vm440_vm1, %v652_v21, %v635_v18  ;;  %v654_v30 = vrot.slane %v635_v18, 4  ;;  %v659_v19 = vsel %vm440_vm1, %v651_v0, %v658_v24  ;;  %v816_v33 = vperm.slane %v812_v27, %v2403_v23 }
 0x176   : > { %662 = vst.msk [vmem:[#allocation2 + $0x8] sm:$0xff] %vm660_vm2, %v653_v29  ;;  %v807_v32 = vsel %vm440_vm1, %v806_v20, %v738_v11  ;;  %v818_v34 = vsel %vm440_vm1, %v817_v28, %v742_v16  ;;  %v759_v35 = vrot.slane %v2492_v26, 4  ;;  %v825_v38 = vrot.slane %v805_v31, 4 }
 0x177   : > { %v655_v49 = vsel %vm440_vm1, %v647_v9, %v654_v30  ;;  %668 = vst.msk [vmem:[#allocation2 + $0x38] sm:$0xff] %vm660_vm2, %v659_v19  ;;  %v811_v36 = vperm.slane %v807_v32, %v2403_v23  ;;  %v822_v37 = vperm.slane %v818_v34, %v2403_v23  ;;  %v771_v39 = vrot.slane %v2441_v1, 4 }
 0x178   : > { %664 = vst.msk [vmem:[#allocation2 + $0x18] sm:$0xff] %vm660_vm2, %v655_v49  ;;  %v837_v42 = vrot.slane %v816_v33, 4  ;;  %v760_v43 = vsel %vm440_vm1, %v2422_v46, %v759_v35  ;;  %v764_v26 = vperm.slane %v2511_v15, %v2403_v23 }
 0x179   : > { %v823_v47 = vrot.slane %v811_v36, 4  ;;  %v826_v48 = vsel %vm440_vm1, %v811_v36, %v825_v38  ;;  %v835_v50 = vrot.slane %v822_v37, 4  ;;  %v768_v59 = vperm.slane %v760_v43, %v2403_v23 }
 0x17a   : > { %v834_v52 = vperm.slane %v826_v48, %v2415_v41  ;;  %v838_v53 = vsel %vm440_vm1, %v822_v37, %v837_v42  ;;  %v769_v54 = vrot.slane %v764_v26, 4  ;;  %v772_v61 = vsel %vm440_vm1, %v764_v26, %v771_v39 }
 0x17b   : > { %v824_v55 = vsel %vm440_vm1, %v823_v47, %v805_v31  ;;  %v836_v46 = vsel %vm440_vm1, %v835_v50, %v816_v33  ;;  %v846_v56 = vperm.slane %v838_v53, %v2415_v41  ;;  %v780_v15 = vperm.slane %v772_v61, %v2415_v41 }
 0x17c   : > { %v830_v57 = vperm.slane %v824_v55, %v2415_v41  ;;  %v842_v60 = vperm.slane %v836_v46, %v2415_v41  ;;  %v853_v44 = vrot.slane %v834_v52, 4  ;;  %v770_v62 = vsel %vm440_vm1, %v769_v54, %v2441_v1 }
 0x17d   : > { %v851_v63 = vrot.slane %v846_v56, 4  ;;  %v776_v13 = vperm.slane %v770_v62, %v2415_v41  ;;  %v781_v45 = vrot.slane %v768_v59, 4  ;;  %v784_v0 = vsel %vm440_vm1, %v768_v59, %v783_v6 }
 0x17e   : > { %v847_v2 = vrot.slane %v842_v60, 4  ;;  %v849_v40 = vrot.slane %v830_v57, 4  ;;  %v854_v3 = vsel %vm440_vm1, %v846_v56, %v853_v44  ;;  %v792_v58 = vperm.slane %v784_v0, %v2415_v41 }
 0x17f   : > { %v852_v4 = vsel %vm440_vm1, %v851_v63, %v834_v52  ;;  %915 = vst.msk [vmem:[#allocation3 + $0x30] sm:$0xff] %vm660_vm2, %v854_v3  ;;  %v782_v1 = vsel %vm440_vm1, %v781_v45, %v2427_v51  ;;  %v793_v5 = vrot.slane %v776_v13, 4  ;;  %v795_v7 = vrot.slane %v780_v15, 4 }
 0x180   : > { %v848_v8 = vsel %vm440_vm1, %v847_v2, %v830_v57  ;;  %v850_v9 = vsel %vm440_vm1, %v842_v60, %v849_v40  ;;  %913 = vst.msk [vmem:[#allocation3 + $0x20] sm:$0xff] %vm660_vm2, %v852_v4  ;;  %v788_v6 = vperm.slane %v782_v1, %v2415_v41  ;;  %v799_v10 = vrot.slane %v792_v58, 4 }
 0x181   : > { %909 = vst.msk [vmem:[#allocation3] sm:$0xff] %vm660_vm2, %v848_v8  ;;  %v794_v11 = vsel %vm440_vm1, 0.0, %v793_v5  ;;  %v796_v12 = vsel %vm440_vm1, 0.0, %v795_v7  ;;  %v855_v14 = vsel %vm440_vm1, %v795_v7, %v776_v13 }
 0x182   : > { %911 = vst.msk [vmem:[#allocation3 + $0x10] sm:$0xff] %vm660_vm2, %v850_v9  ;;  %v797_v51 = vrot.slane %v788_v6, 4  ;;  %v800_v16 = vsel %vm440_vm1, 0.0, %v799_v10  ;;  %v859_v17 = vperm.slane %v855_v14, %v2403_v23  ;;  %v860_v18 = vrot.slane %v796_v12, 4 }
 0x183   : > { %v866_v21 = vsel %vm440_vm1, %v799_v10, %v788_v6  ;;  %v871_v22 = vrot.slane %v800_v16, 4 }
 0x184   : > { %v798_v24 = vsel %vm440_vm1, 0.0, %v797_v51  ;;  %v861_v25 = vsel %vm440_vm1, %v860_v18, %v794_v11  ;;  %v870_v20 = vperm.slane %v866_v21, %v2403_v23  ;;  %v879_v27 = vrot.slane %v859_v17, 4 }
 0x185   : > { %v865_v28 = vperm.slane %v861_v25, %v2403_v23  ;;  %v872_v29 = vsel %vm440_vm1, %v871_v22, %v798_v24 }
 0x186   : > { %v876_v30 = vperm.slane %v872_v29, %v2403_v23  ;;  %v891_v19 = vrot.slane %v870_v20, 4 }
 0x187   : > { %v877_v31 = vrot.slane %v865_v28, 4  ;;  %v880_v32 = vsel %vm440_vm1, %v865_v28, %v879_v27 }
 0x188   : > { %v888_v33 = vperm.slane %v880_v32, %v2415_v41  ;;  %v889_v34 = vrot.slane %v876_v30, 4  ;;  %v892_v35 = vsel %vm440_vm1, %v876_v30, %v891_v19 }
 0x189   : > { %v878_v49 = vsel %vm440_vm1, %v877_v31, %v859_v17  ;;  %v900_v36 = vperm.slane %v892_v35, %v2415_v41 }
 0x18a   : > { %v884_v37 = vperm.slane %v878_v49, %v2415_v41  ;;  %v890_v38 = vsel %vm440_vm1, %v889_v34, %v870_v20  ;;  %v907_v39 = vrot.slane %v888_v33, 4 }
 0x18b   : > { %v896_v23 = vperm.slane %v890_v38, %v2415_v41  ;;  %v905_v42 = vrot.slane %v900_v36, 4 }
 0x18c   : > { %v903_v43 = vrot.slane %v884_v37, 4  ;;  %v908_v26 = vsel %vm440_vm1, %v900_v36, %v907_v39 }
 0x18d   : > { %v901_v47 = vrot.slane %v896_v23, 4  ;;  %v906_v48 = vsel %vm440_vm1, %v905_v42, %v888_v33  ;;  %916 = vst.msk [vmem:[#allocation3 + $0x38] sm:$0xff] %vm660_vm2, %v908_v26 }
 0x18e   : > { %v904_v50 = vsel %vm440_vm1, %v896_v23, %v903_v43  ;;  %914 = vst.msk [vmem:[#allocation3 + $0x28] sm:$0xff] %vm660_vm2, %v906_v48 }
 0x18f   : > { %v902_v59 = vsel %vm440_vm1, %v901_v47, %v884_v37  ;;  %912 = vst.msk [vmem:[#allocation3 + $0x18] sm:$0xff] %vm660_vm2, %v904_v50 }
 0x190   : > { %910 = vst.msk [vmem:[#allocation3 + $0x8] sm:$0xff] %vm660_vm2, %v902_v59 }
 0x191 PF: > { %v923_v41 = vld [vmem:[#allocation7 + $0x18] sm:$0xff]  ;;  %v922_v52 = vld [vmem:[#allocation7 + $0x10] sm:$0xff]  ;;  %s1661_s17 = sshll.u32 %s2133_s27, 3  ;;  %v921_v53 = vld [vmem:[#allocation7 + $0x8] sm:$0xff]  ;;  %vm924_vm3 = vcmask 261120   ;;  %s2162_s19 = smov 104  }
 0x192   : > { %940 = vmatpush.msra.mxu0 %v923_v41  ;;  %s918_s13 = scalar_lea.vmem %s2371_s15, %s1661_s17 [#allocation4]  ;;  %v920_v54 = vld [vmem:[#allocation7] sm:$0xff]  ;;  %s2163_s1 = smov 120   ;;  %v1074_v46 = vld [vmem:[#allocation2 + $0x28] sm:$0xff]  ;;  %vm1077_vm4 = vcmask 64512   ;;  %v1076_v15 = vld [vmem:[#allocation2 + $0x38] sm:$0xff]  ;;  %vm959_vm5 = vcmask 1047556  }
 0x193   : > { %v919_v61 = vld [vmem:[%s918_s13] sm:$0xff]  ;;  %s2164_s8 = smov 112   ;;  %v1070_v56 = vld [vmem:[#allocation2 + $0x8] sm:$0xff]  ;;  %1669 = vmatpush.xpose.msk.msra.mxu3 %vm1077_vm4, %v1074_v46  ;;  %v1072_v57 = vld [vmem:[#allocation2 + $0x18] sm:$0xff]  ;;  %v2165_v63 = vmov 1983009808  }
 0x194   : > { %941 = vmatpush.msra.mxu0 %v922_v52  ;;  %1663 = vmatpush.xpose.msk.msra.mxu1 %vm1077_vm4, %v1070_v56  ;;  %v1073_v60 = vld [vmem:[#allocation2 + $0x20] sm:$0xff]  ;;  %v1075_v62 = vld [vmem:[#allocation2 + $0x30] sm:$0xff]  ;;  %v964_v13 = vunpack.c.l.s4 %v2165_v63  ;;  %v2166_v5 = vmov 1934713408   ;;  %vm1194_vm6 = vcmask 130048   ;;  %s2167_s21 = smov 16  }
 0x195   : > { %1666 = vmatpush.xpose.msk.msra.mxu2 %vm1077_vm4, %v1072_v57  ;;  %v1069_v44 = vld [vmem:[#allocation2] sm:$0xff]  ;;  %v1071_v45 = vld [vmem:[#allocation2 + $0x10] sm:$0xff]  ;;  %v988_v7 = vunpack.c.l.s4 %v2166_v5  ;;  %s2168_s9 = smov 24   ;;  %s2169_s20 = smov 8   ;;  %vm1463_vm7 = vcmask 195584  }
 0x196   : > { %942 = vmatpush.msra.mxu0 %v921_v53  ;;  %v2637_v58 = vunpack.c.0.s8 %v964_v13  ;;  %s1681_s18 = sshll.u32 %s2137_s28, 1  ;;  %s2841_s10 = sld [smem:[#allocation28_spill]] }
 0x197   : > { %1670 = vmatpush.xpose.msk.msra.mxu3 %vm1077_vm4, %v1073_v60  ;;  %v2643_v11 = vunpack.c.0.s8 %v988_v7  ;;  %s1508_s3 = sadd.s32 %s2133_s27, %s1681_s18  ;;  %s2842_s13 = sld [smem:[#allocation27_spill]] }
 0x198   : > { %943 = vmatpush.msra.mxu0 %v920_v54  ;;  %1664 = vmatpush.xpose.msk.msra.mxu1 %vm1077_vm4, %v1069_v44  ;;  %s1682_s4 = sshll.u32 %s1508_s3, 3  ;;  %s1498_s27 = scalar_lea.sflag [#allocation6], %s349_s5 }
 0x199   : > { %1662 = vmatmul.msk.f32.vlgmr.msra.gmra.mxu0 %vm924_vm3, %v919_v61  ;;  %1667 = vmatpush.xpose.msk.msra.mxu2 %vm1077_vm4, %v1071_v45 }
 0x19a   : > { %1672 = vmatpush.xpose.msk.msrb.mxu0 %vm1077_vm4, %v1076_v15 }
 0x19c   : > { %s1510_s11 = scalar_lea.hbm %s2841_s10, %s1682_s4 }
 0x19e   : > { %1673 = vmatpush.xpose.msk.msrb.mxu0 %vm1077_vm4, %v1075_v62 }
 0x216   : > { %v945_v55 = vpop.f32.mrf.mxu0 }
 0x217   : > { %955 = vrot.lane.b32.xlu1 %v945_v55, %s2162_s19  ;;  %949 = vrot.lane.b32.xlu0 %v945_v55, %s2163_s1  ;;  %v961_v9 = vrot.slane %v945_v55, 4  ;;  %s1512_s19 = sshll.u32 %s351_s29, 4  ;;  %s1514_s1 = sshll.u32 %s1510_s11, 4  ;;  %s1513_s19 = int_to_ptr.vmem [resolvable:$true] %s1512_s19  ;;  %s1515_s1 = int_to_ptr.hbm [resolvable:$true] %s1514_s1 }
 0x218   : > { %s2033_s28 = sshra.s32 %s1515_s1, 4  ;;  %s2034_s28 = int_to_ptr.hbm [resolvable:$true] %s2033_s28 }
 0x219   : > { %p2040_p2 = scmp.lt.s32.totalorder %s2034_s28, %s2841_s10 }
 0x21f   : > { %952 = vrot.lane.b32.xlu0 %v945_v55, %s2164_s8  ;;  %s2035_s8 = scalar_lea.hbm %s2034_s28, 8 }
 0x220   : > { %p2036_p1 = scmp.ne.s32.totalorder %s2034_s28, %s2035_s8 }
 0x222   : > { %p2037_p11 = pnand %p2036_p1, %p2275_p6 }
 0x224   : > { %p2038_p0 = pneg %p2037_p11 }
 0x289   : > { %v956_v0 = vpop.permute.xlu1 %955  ;;  %v950_v2 = vpop.permute.xlu0 %949 }
 0x28a   : > { %v971_v40 = vrot.slane %v956_v0, 4  ;;  %v973_v3 = vrot.slane %v950_v2, 4 }
 0x28c   : > { %v974_v4 = vsel %vm959_vm5, %v956_v0, %v973_v3  ;;  %v972_v1 = vsel %vm959_vm5, %v971_v40, %v950_v2 }
 0x28d   : > { %v982_v8 = vperm.slane %v974_v4, %v2637_v58  ;;  %v978_v6 = vperm.slane %v972_v1, %v2637_v58 }
 0x28f   : > { %v995_v51 = vrot.slane %v982_v8, 4  ;;  %v983_v18 = vrot.slane %v978_v6, 4 }
 0x291   : > { %v953_v10 = vpop.permute.xlu0 %952 }
 0x292   : > { %v958_v12 = vrot.slane %v953_v10, 4  ;;  %v962_v14 = vsel %vm959_vm5, %v953_v10, %v961_v9 }
 0x293   : > { %v970_v16 = vperm.slane %v962_v14, %v2637_v58 }
 0x294   : > { %v960_v17 = vsel %vm959_vm5, %v958_v12, %v945_v55 }
 0x295   : > { %v966_v21 = vperm.slane %v960_v17, %v2637_v58  ;;  %v996_v22 = vsel %vm959_vm5, %v995_v51, %v970_v16  ;;  %v997_v24 = vrot.slane %v970_v16, 4 }
 0x296   : > { %v1002_v25 = vperm.slane %v996_v22, %v2643_v11 }
 0x297   : > { %v984_v20 = vsel %vm959_vm5, %v983_v18, %v966_v21  ;;  %v985_v27 = vrot.slane %v966_v21, 4  ;;  %v998_v28 = vsel %vm959_vm5, %v982_v8, %v997_v24 }
 0x298   : > { %v990_v29 = vperm.slane %v984_v20, %v2643_v11  ;;  %v1006_v30 = vperm.slane %v998_v28, %v2643_v11  ;;  %v1011_v32 = vrot.slane %v1002_v25, 4 }
 0x299   : > { %v986_v19 = vsel %vm959_vm5, %v978_v6, %v985_v27 }
 0x29a   : > { %v994_v31 = vperm.slane %v986_v19, %v2643_v11  ;;  %v1013_v33 = vrot.slane %v1006_v30, 4  ;;  %v1007_v34 = vrot.slane %v990_v29, 4  ;;  %v1012_v23 = vsel %vm959_vm5, 0.0, %v1011_v32 }
 0x29c   : > { %v1009_v35 = vrot.slane %v994_v31, 4  ;;  %v1014_v49 = vsel %vm959_vm5, 0.0, %v1013_v33  ;;  %v1026_v36 = vsel %vm959_vm5, %v1013_v33, %v1002_v25  ;;  %v1008_v50 = vsel %vm959_vm5, 0.0, %v1007_v34 }
 0x29d   : > { %v1030_v37 = vperm.slane %v1026_v36, %v2637_v58  ;;  %v1031_v38 = vrot.slane %v1014_v49, 4  ;;  %v1240_v49 = vld [vmem:[#allocation3 + $0x8] sm:$0xff]  ;;  %v1239_v36 = vld [vmem:[#allocation3] sm:$0xff] }
 0x29e   : > { %v1010_v39 = vsel %vm959_vm5, 0.0, %v1009_v35  ;;  %v1015_v42 = vsel %vm959_vm5, %v1009_v35, %v990_v29  ;;  %1264 = vmatpush.msrb.mxu1 %v1240_v49 }
 0x29f   : > { %v1032_v43 = vsel %vm959_vm5, %v1031_v38, %v1012_v23  ;;  %v1019_v26 = vperm.slane %v1015_v42, %v2637_v58  ;;  %v1020_v47 = vrot.slane %v1010_v39, 4  ;;  %v1051_v48 = vrot.slane %v1030_v37, 4  ;;  %v1243_v38 = vld [vmem:[#allocation3 + $0x20] sm:$0xff]  ;;  %v1242_v39 = vld [vmem:[#allocation3 + $0x18] sm:$0xff]  ;;  %v1241_v23 = vld [vmem:[#allocation3 + $0x10] sm:$0xff] }
 0x2a0   : > { %v1036_v59 = vperm.slane %v1032_v43, %v2637_v58  ;;  %1265 = vmatpush.msrb.mxu1 %v1239_v36  ;;  %1287 = vmatpush.msrb.mxu2 %v1242_v39  ;;  %v1246_v42 = vld [vmem:[#allocation3 + $0x38] sm:$0xff] }
 0x2a1   : > { %v1021_v41 = vsel %vm959_vm5, %v1020_v47, %v1008_v50  ;;  %v1039_v52 = vrot.slane %v1019_v26, 4  ;;  %1333 = vmatpush.msra.mxu0 %v1246_v42 }
 0x2a2   : > { %v1025_v53 = vperm.slane %v1021_v41, %v2637_v58  ;;  %v1052_v54 = vsel %vm959_vm5, %v1036_v59, %v1051_v48  ;;  %v1049_v61 = vrot.slane %v1036_v59, 4  ;;  %1288 = vmatpush.msrb.mxu2 %v1241_v23 }
 0x2a3   : > { %v1060_v55 = vperm.slane %v1052_v54, %v2643_v11 }
 0x2a4   : > { %v1040_v46 = vsel %vm959_vm5, %v1025_v53, %v1039_v52  ;;  %v1037_v56 = vrot.slane %v1025_v53, 4  ;;  %v1050_v15 = vsel %vm959_vm5, %v1049_v61, %v1030_v37  ;;  %v1244_v37 = vld [vmem:[#allocation3 + $0x28] sm:$0xff] }
 0x2a5   : > { %v1048_v57 = vperm.slane %v1040_v46, %v2643_v11  ;;  %v1065_v60 = vrot.slane %v1060_v55, 4  ;;  %v1056_v44 = vperm.slane %v1050_v15, %v2643_v11  ;;  %1310 = vmatpush.msrb.mxu3 %v1244_v37 }
 0x2a6   : > { %v1038_v62 = vsel %vm959_vm5, %v1037_v56, %v1019_v26  ;;  %v1245_v26 = vld [vmem:[#allocation3 + $0x30] sm:$0xff] }
 0x2a7   : > { %v1066_v63 = vsel %vm959_vm5, %v1065_v60, %v1048_v57  ;;  %v1044_v13 = vperm.slane %v1038_v62, %v2643_v11  ;;  %v1061_v45 = vrot.slane %v1056_v44, 4  ;;  %v1067_v0 = vrot.slane %v1048_v57, 4  ;;  %1311 = vmatpush.msrb.mxu3 %v1243_v38  ;;  %1334 = vmatpush.msra.mxu0 %v1245_v26 }
 0x2a8   : > { %1671 = vmatmul.msk.f32.vlgmr.msra.gmra.mxu3 %vm1077_vm4, %v1066_v63 }
 0x2a9   : > { %v1062_v2 = vsel %vm959_vm5, %v1061_v45, %v1044_v13  ;;  %v1068_v40 = vsel %vm959_vm5, %v1060_v55, %v1067_v0  ;;  %v1063_v3 = vrot.slane %v1044_v13, 4 }
 0x2aa   : > { %1665 = vmatmul.msk.f32.vlgmr.msra.gmra.mxu1 %vm1077_vm4, %v1062_v2  ;;  %1674 = vmatmul.msk.f32.vlgmr.msrb.gmra.mxu0 %vm1077_vm4, %v1068_v40 }
 0x2ab   : > { %v1064_v4 = vsel %vm959_vm5, %v1056_v44, %v1063_v3 }
 0x2ac   : > { %1668 = vmatmul.msk.f32.vlgmr.msra.gmra.mxu2 %vm1077_vm4, %v1064_v4 }
 0x327   : > { %v1191_v1 = vpop.f32.mrf.mxu0  ;;  %v1104_v10 = vpop.f32.mrf.mxu1 }
 0x328   : > { %v1204_v5 = vsel %vm1194_vm6, %v1191_v1, -inf  ;;  %v1195_v12 = vsel %vm1194_vm6, %v1104_v10, -inf }
 0x329   : > { %1205 = vmax.xlane.f32.xlu0 %v1204_v5 }
 0x32b   : > { %v1162_v7 = vpop.f32.mrf.mxu3 }
 0x32c   : > { %v1201_v8 = vsel %vm1194_vm6, %v1162_v7, -inf }
 0x32d   : > { %1202 = vmax.xlane.f32.xlu1 %v1201_v8 }
 0x32f   : > { %v1133_v9 = vpop.f32.mrf.mxu2 }
 0x330   : > { %v1198_v6 = vsel %vm1194_vm6, %v1133_v9, -inf }
 0x331   : > { %1199 = vmax.xlane.f32.xlu2 %v1198_v6 }
 0x339   : > { %1196 = vmax.xlane.f32.xlu2 %v1195_v12 }
 0x39c   : > { %v1206_v28 = vpop.xlane.xlu0 %1205 }
 0x39d   : > { %v1210_v30 = vsub.f32 %v1191_v1, %v1206_v28 }
 0x39f   : > { %v1217_v31 = vmul.f32 1.442695, %v1210_v30 }
 0x3a0   : > { %v1203_v51 = vpop.xlane.xlu1 %1202 }
 0x3a1   : > { %v1209_v18 = vsub.f32 %v1162_v7, %v1203_v51 }
 0x3a3   : > { %v1215_v22 = vmul.f32 1.442695, %v1209_v18 }
 0x3a4   : > { %v1200_v14 = vpop.xlane.xlu2 %1199 }
 0x3a5   : > { %v1208_v25 = vsub.f32 %v1133_v9, %v1200_v14 }
 0x3a7   : > { %v1213_v27 = vmul.f32 1.442695, %v1208_v25 }
 0x3ac   : > { %v1197_v16 = vpop.xlane.xlu2 %1196 }
 0x3ad   : > { %v1207_v17 = vsub.f32 %v1104_v10, %v1197_v16 }
 0x3af   : > { %v1211_v21 = vmul.f32 1.442695, %v1207_v17 }
 0x3b1   : > { %1853 = vpow2.f32 %v1211_v21 }
 0x3b2   : > { %1855 = vpow2.f32 %v1215_v22 }
 0x3b3   : > { %1857 = vpow2.f32 %v1213_v27 }
 0x3b4   : > { %1859 = vpow2.f32 %v1217_v31 }
 0x3b7   : > { %v1854_v24 = vpop.eup %1853 }
 0x3b8   : > { %v1219_v20 = vsel %vm1194_vm6, %v1854_v24, 0.0  ;;  %v1856_v29 = vpop.eup %1855 }
 0x3b9   : > { %1220 = vadd.xlane.f32.xlu2 %v1219_v20  ;;  %v1225_v19 = vsel %vm1194_vm6, %v1856_v29, 0.0  ;;  %v1858_v32 = vpop.eup %1857 }
 0x3ba   : > { %v1222_v33 = vsel %vm1194_vm6, %v1858_v32, 0.0  ;;  %v1860_v34 = vpop.eup %1859 }
 0x3bb   : > { %v1228_v35 = vsel %vm1194_vm6, %v1860_v34, 0.0 }
 0x3c1   : > { %1226 = vadd.xlane.f32.xlu2 %v1225_v19 }
 0x3c9   : > { %1223 = vadd.xlane.f32.xlu2 %v1222_v33 }
 0x3d1   : > { %1229 = vadd.xlane.f32.xlu2 %v1228_v35 }
 0x42c   : > { %v1221_v43 = vpop.xlane.xlu2 %1220 }
 0x42d   : > { %1861 = vrcp.f32 %v1221_v43 }
 0x433   : > { %v1862_v47 = vpop.eup %1861 }
 0x434   : > { %v1227_v48 = vpop.xlane.xlu2 %1226  ;;  %v1235_v50 = vmul.f32 %v1862_v47, %v1854_v24 }
 0x435   : > { %1863 = vrcp.f32 %v1227_v48 }
 0x436   : > { %1675 = vmatmul.msk.f32.vlgmr.msrb.gmra.mxu1 %vm1194_vm6, %v1235_v50 }
 0x43b   : > { %v1864_v59 = vpop.eup %1863 }
 0x43c   : > { %v1224_v41 = vpop.xlane.xlu2 %1223  ;;  %v1237_v52 = vmul.f32 %v1864_v59, %v1856_v29 }
 0x43d   : > { %1865 = vrcp.f32 %v1224_v41 }
 0x43e   : > { %1677 = vmatmul.msk.f32.vlgmr.msrb.gmra.mxu3 %vm1194_vm6, %v1237_v52 }
 0x443   : > { %v1866_v53 = vpop.eup %1865 }
 0x444   : > { %v1230_v54 = vpop.xlane.xlu2 %1229  ;;  %v1236_v61 = vmul.f32 %v1866_v53, %v1858_v32 }
 0x445   : > { %1867 = vrcp.f32 %v1230_v54 }
 0x446   : > { %1676 = vmatmul.msk.f32.vlgmr.msrb.gmra.mxu2 %vm1194_vm6, %v1236_v61 }
 0x44b   : > { %v1868_v55 = vpop.eup %1867 }
 0x44c   : > { %v1238_v46 = vmul.f32 %v1868_v55, %v1860_v34 }
 0x44e   : > { %1678 = vmatmul.msk.f32.vlgmr.msra.gmra.mxu0 %vm1194_vm6, %v1238_v46 }
 0x4b3   : > { %v1267_v56 = vpop.f32.mrf.mxu1 }
 0x4b4   : > { %v1341_v57 = vrot.slane %v1267_v56, 4 }
 0x4c1   : > { %v1313_v15 = vpop.f32.mrf.mxu3 }
 0x4c2   : > { %v1339_v60 = vrot.slane %v1313_v15, 4  ;;  %v1342_v44 = vsel %vm959_vm5, %v1313_v15, %v1341_v57 }
 0x4c3   : > { %v1350_v63 = vperm.slane %v1342_v44, %v2637_v58  ;;  %v1467_v44 = vld [vmem:[#allocation12 + $0x10] sm:$0xff] }
 0x4c4   : > { %v1340_v62 = vsel %vm959_vm5, %v1339_v60, %v1267_v56  ;;  %v1468_v60 = vld [vmem:[#allocation12 + $0x18] sm:$0xff] }
 0x4c5   : > { %v1346_v0 = vperm.slane %v1340_v62, %v2637_v58  ;;  %v1377_v4 = vrot.slane %v1350_v63, 4  ;;  %1488 = vmatpush.msra.mxu1 %v1468_v60  ;;  %v1465_v62 = vld [vmem:[#allocation12] sm:$0xff] }
 0x4c7   : > { %v1365_v7 = vrot.slane %v1346_v0, 4  ;;  %1489 = vmatpush.msra.mxu1 %v1467_v44 }
 0x4c9   : > { %v1290_v13 = vpop.f32.mrf.mxu2 }
 0x4ca   : > { %v1353_v45 = vrot.slane %v1290_v13, 4 }
 0x4cb   : > { %v1336_v2 = vpop.f32.mrf.mxu0 }
 0x4cc   : > { %v1351_v40 = vrot.slane %v1336_v2, 4  ;;  %v1354_v3 = vsel %vm959_vm5, %v1336_v2, %v1353_v45 }
 0x4cd   : > { %v1362_v1 = vperm.slane %v1354_v3, %v2637_v58  ;;  %v1852_v3 = vld [vmem:[%s2842_s13] ss:$0 sm:$0xff] }
 0x4ce   : > { %v1352_v5 = vsel %vm959_vm5, %v1351_v40, %v1290_v13 }
 0x4cf   : > { %v1358_v8 = vperm.slane %v1352_v5, %v2637_v58  ;;  %v1375_v9 = vrot.slane %v1362_v1, 4  ;;  %v1378_v6 = vsel %vm959_vm5, %v1362_v1, %v1377_v4 }
 0x4d0   : > { %v1386_v10 = vperm.slane %v1378_v6, %v2643_v11 }
 0x4d1   : > { %v1363_v12 = vrot.slane %v1358_v8, 4  ;;  %v1366_v14 = vsel %vm959_vm5, %v1358_v8, %v1365_v7  ;;  %v1376_v51 = vsel %vm959_vm5, %v1375_v9, %v1350_v63 }
 0x4d2   : > { %v1374_v16 = vperm.slane %v1366_v14, %v2643_v11  ;;  %v1382_v17 = vperm.slane %v1376_v51, %v2643_v11  ;;  %v1393_v18 = vrot.slane %v1386_v10, 4 }
 0x4d3   : > { %v1364_v21 = vsel %vm959_vm5, %v1363_v12, %v1346_v0 }
 0x4d4   : > { %v1370_v22 = vperm.slane %v1364_v21, %v2643_v11  ;;  %v1389_v24 = vrot.slane %v1374_v16, 4  ;;  %v1391_v25 = vrot.slane %v1382_v17, 4  ;;  %v1394_v20 = vsel %vm959_vm5, 0.0, %v1393_v18 }
 0x4d5   : > { %v1406_v27 = vsel %vm959_vm5, %v1393_v18, %v1382_v17  ;;  %v1411_v28 = vrot.slane %v1394_v20, 4 }
 0x4d6   : > { %v1387_v29 = vrot.slane %v1370_v22, 4  ;;  %v1390_v30 = vsel %vm959_vm5, 0.0, %v1389_v24  ;;  %v1392_v19 = vsel %vm959_vm5, 0.0, %v1391_v25  ;;  %v1410_v31 = vperm.slane %v1406_v27, %v2637_v58 }
 0x4d7   : > { %v1400_v32 = vrot.slane %v1390_v30, 4  ;;  %v1395_v33 = vsel %vm959_vm5, %v1389_v24, %v1370_v22  ;;  %v1412_v34 = vsel %vm959_vm5, %v1411_v28, %v1392_v19 }
 0x4d8   : > { %v1388_v35 = vsel %vm959_vm5, 0.0, %v1387_v29  ;;  %v1399_v49 = vperm.slane %v1395_v33, %v2637_v58  ;;  %v1416_v36 = vperm.slane %v1412_v34, %v2637_v58  ;;  %v1431_v37 = vrot.slane %v1410_v31, 4 }
 0x4d9   : > { %v1401_v38 = vsel %vm959_vm5, %v1400_v32, %v1388_v35 }
 0x4da   : > { %v1405_v39 = vperm.slane %v1401_v38, %v2637_v58  ;;  %v1419_v23 = vrot.slane %v1399_v49, 4  ;;  %v1432_v42 = vsel %vm959_vm5, %v1416_v36, %v1431_v37  ;;  %v1429_v43 = vrot.slane %v1416_v36, 4 }
 0x4db   : > { %v1440_v26 = vperm.slane %v1432_v42, %v2643_v11 }
 0x4dc   : > { %v1420_v47 = vsel %vm959_vm5, %v1405_v39, %v1419_v23  ;;  %v1417_v48 = vrot.slane %v1405_v39, 4  ;;  %v1430_v50 = vsel %vm959_vm5, %v1429_v43, %v1410_v31 }
 0x4dd   : > { %v1428_v59 = vperm.slane %v1420_v47, %v2643_v11  ;;  %v1445_v41 = vrot.slane %v1440_v26, 4  ;;  %v1436_v52 = vperm.slane %v1430_v50, %v2643_v11 }
 0x4de   : > { %v1418_v53 = vsel %vm959_vm5, %v1417_v48, %v1399_v49 }
 0x4df   : > { %v1446_v58 = vsel %vm959_vm5, %v1445_v41, %v1428_v59  ;;  %v1447_v54 = vrot.slane %v1428_v59, 4  ;;  %v1424_v61 = vperm.slane %v1418_v53, %v2643_v11  ;;  %v1441_v55 = vrot.slane %v1436_v52, 4  ;;  %v1466_v11 = vld [vmem:[#allocation12 + $0x8] sm:$0xff] }
 0x4e0   : > { %1454 = vrot.lane.b32.xlu1 %v1446_v58, %s2167_s21  ;;  %1490 = vmatpush.msra.mxu1 %v1466_v11 }
 0x4e1   : > { %v1448_v46 = vsel %vm959_vm5, %v1440_v26, %v1447_v54  ;;  %v1443_v56 = vrot.slane %v1424_v61, 4  ;;  %v1442_v15 = vsel %vm959_vm5, %v1441_v55, %v1424_v61 }
 0x4e2   : > { %1458 = vrot.lane.b32.xlu0 %v1448_v46, %s2168_s9  ;;  %1491 = vmatpush.msra.mxu1 %v1465_v62 }
 0x4e3   : > { %v1444_v57 = vsel %vm959_vm5, %v1436_v52, %v1443_v56 }
 0x4e4   : > { %1450 = vrot.lane.b32.xlu2 %v1444_v57, %s2169_s20  ;;  %s2039_s20 = scalar_lea.hbm %s2841_s10, 32 }
 0x4e5   : > { %p2041_p3 = scmp.lt.s32.totalorder %s2039_s20, %s2035_s8 }
 0x4e7   : > { %p2042_p5 = por %p2041_p3, %p2040_p2 }
 0x4e9   : > { %p2043_p7 = pnand %p2042_p5, %p2038_p0 }
 0x53e   : > { %v1451_v63 = vpop.permute.xlu2 %1450 }
 0x53f   : > { %v1461_v13 = vsel %vm1077_vm4, %v1442_v15, %v1451_v63 }
 0x552   : > { %v1455_v45 = vpop.permute.xlu1 %1454 }
 0x553   : > { %v1462_v0 = vsel %vm1194_vm6, %v1461_v13, %v1455_v45 }
 0x554   : > { %v1459_v2 = vpop.permute.xlu0 %1458 }
 0x555   : > { %v1464_v40 = vsel %vm1463_vm7, %v1462_v0, %v1459_v2 }
 0x556   : > { %1679 = vmatmul.msk.f32.vlgmr.msra.gmra.mxu1 %vm924_vm3, %v1464_v40 }
 0x5d3   : > { %v1493_v4 = vpop.f32.mrf.mxu1 }
 0x5d4   : > { %v1494_v1 = vadd.f32 %v1852_v3, %v1493_v4 }
 0x5d6   : > { %1496 = vst.msk [vmem:[%s351_s29] sm:$0xff] %vm924_vm3, %v1494_v1 }
 0x5d7   : > { %2046 = shalt.err (!%p2043_p7)
}
 0x5d8   : > { %1712 = dma.vmem_to_hbm [thread:$0]  (%p2275_p6), %s1513_s19, 128, %s1515_s1, %s1498_s27  }
 0x5d9 PF: > { %s2843_s5 = sld [smem:[#allocation18_spill]]  ;;  %p1744_p8 = scmp.ge.s32.totalorder %s2149_s7, 2 }
 0x5db   : > { %p1732_p9 = pnand %p1744_p8, %p2281_p10 }
 0x5dd   : > { %p1733_p12 = pneg %p1732_p9 }
 0x5df   : > { %s1526_s29 = sand.u32 1, %s2843_s5  }
 0x5e0   : > { %s1527_s4 = scalar_lea.sflag [#allocation6], %s1526_s29 }
 0x5e1   : > { %2104 = dma.done.wait (%p1733_p12), %s1527_s4, 128  }
 0x5e2   : > { %2106 = vsyncadd (%p1733_p12), %s1527_s4, 4294967168  ;;  %s24_s7 = sadd.s32 1, %s2149_s7   ;;  %s2845_s27 = sld [smem:[#allocation19_spill]] }
 0x5e3   : > { %p21_p13 = scmp.ge.s32.totalorder %s24_s7, 6   ;;  %s2846_s29 = sld [smem:[#allocation21_spill]] }
 0x5e4   : > { %s2847_s12 = sld [smem:[#allocation22_spill]]  ;;  %s2848_s21 = smov %s2113_s22 }
 0x5e5   : > { %s2849_s22 = smov %s2117_s23  ;;  %s2850_s23 = smov %s2356_s2 }
 0x5e6   : > { %s2851_s24 = smov %s2125_s25  ;;  %s2852_s25 = smov %s2129_s26 }
 0x5e7   : > { %s2853_s26 = smov %s2353_s16  ;;  %s2854_s28 = smov %s2145_s30 }
 0x5e8   :  { %23 = sbr.rel (!%p21_p13) target bundleno = 18 (0x12), region = 110 }
 0x5ea   : > { %s2855_s30 = smov %s2847_s12 }
 0x5ed   :  { %1533 = vsyncpa [#allocation5], 1 }
 0x5ee   :  { %1535 = vsyncpa [#allocation5 + $0x1], 1 }
 0x5ef   :  { %1536 = vsyncpa [#allocation8], 1 }
 0x5f0   :  { %1537 = vsyncpa [#allocation11], 1 }
 0x5f1   :  { %1538 = vsyncpa [#allocation6], 1 }
 0x5f2   :  { %1540 = vsyncpa [#allocation6 + $0x1], 1 }

// kernel: tpu_custom_call.1
= control target key start
LH: loop header
LB: loop body
LE: loop exit
PB: predicated region body
PF: predicated region fallthrough
CT: control target
= control target key end

     0   :  { %s2802_s0 = inlined_call_operand.hbm [shape: f32[2,16,32], index: 0, kind: input, shape index: {}]   ;;  %s2803_s1 = inlined_call_operand.hbm [shape: f32[32,32], index: 1, kind: input, shape index: {}]   ;;  %s2804_s2 = inlined_call_operand.hbm [shape: f32[32,32], index: 2, kind: input, shape index: {}]   ;;  %s2805_s3 = inlined_call_operand.hbm [shape: f32[32,32], index: 3, kind: input, shape index: {}]   ;;  %s2806_s4 = inlined_call_operand.hbm [shape: f32[32,32], index: 4, kind: input, shape index: {}]   ;;  %s2807_s5 = inlined_call_operand.vmem [shape: f32[1,32], index: 5, kind: input, shape index: {}]   ;;  %s2808_s6 = inlined_call_operand.hbm [shape: f32[2,16,32], index: 6, kind: output, shape index: {}]  }
   0x1   :  { %2817 = sst [smem:[#allocation23_spill]] %s2803_s1 }
   0x2   :  { %2818 = sst [smem:[#allocation24_spill]] %s2804_s2 }
   0x3   :  { %2819 = sst [smem:[#allocation25_spill]] %s2805_s3 }
   0x4   :  { %2820 = sst [smem:[#allocation26_spill]] %s2806_s4 }
   0x5   :  { %2821 = sst [smem:[#allocation27_spill]] %s2807_s5 }
   0x6   :  { %2822 = sst [smem:[#allocation28_spill]] %s2808_s6 }
   0x7   :  { %11 = vsyncpa [#allocation5], 0 }
   0x8   :  { %13 = vsyncpa [#allocation5 + $0x1], 0 }
   0x9   :  { %14 = vsyncpa [#allocation8], 0 }
   0xa   :  { %15 = vsyncpa [#allocation11], 0 }
   0xb   :  { %16 = vsyncpa [#allocation6], 0 }
   0xc   :  { %18 = vsyncpa [#allocation6 + $0x1], 0  ;;  %s2205_s21 = smov 0   ;;  %s2207_s22 = smov 0  }
   0xd   :  { %s2209_s23 = smov 0   ;;  %s2211_s24 = smov 0  }
   0xe   :  { %s2213_s25 = smov 0   ;;  %s2215_s26 = smov 0  }
   0xf   :  { %s2217_s27 = smov 0   ;;  %s2219_s28 = smov 0  }
  0x10   :  { %s2221_s29 = smov 0   ;;  %s2223_s30 = smov 0  }
  0x11   :  { %s2225_s7 = smov 0  }
  0x12 LB: > { %2823 = sst [smem:[#allocation18_spill]] %s2109_s21  ;;  %s1638_s8 = sadd.s32 4294967295, %s2149_s7   ;;  %s2149_s7 = sphi %s2225_s7, %s24_s7   ;;  %s2145_s30 = sphi %s2223_s30, %s2855_s30   ;;  %s2141_s29 = sphi %s2221_s29, %s2846_s29   ;;  %s2137_s28 = sphi %s2219_s28, %s2854_s28   ;;  %s2133_s27 = sphi %s2217_s27, %s2845_s27   ;;  %s2129_s26 = sphi %s2215_s26, %s2853_s26   ;;  %s2125_s25 = sphi %s2213_s25, %s2852_s25   ;;  %s2121_s24 = sphi %s2211_s24, %s2851_s24   ;;  %s2117_s23 = sphi %s2209_s23, %s2850_s23   ;;  %s2113_s22 = sphi %s2207_s22, %s2849_s22   ;;  %s2109_s21 = sphi %s2205_s21, %s2848_s21  }
  0x13   : > { %2824 = sst [smem:[#allocation19_spill]] %s2141_s29  ;;  %s1639_s9 = sadd.s32 4294967294, %s2149_s7  }
  0x14   : > { %p56_p0 = scmp.ne.s32.totalorder %s2125_s25, %s2121_s24  ;;  %p2261_p1 = scmp.eq.s32.totalorder %s1638_s8, 0 }
  0x15   : > { %p186_p2 = scmp.ne.s32.totalorder %s2117_s23, %s2113_s22  ;;  %p187_p3 = scmp.eq.s32.totalorder %s1638_s8, 3 }
  0x16   : > { %p2269_p4 = por %p2261_p1, %p56_p0  ;;  %p192_p5 = scmp.ne.s32.totalorder %s2113_s22, %s2109_s21 }
  0x17   : > { %p2275_p6 = por %p187_p3, %p186_p2  ;;  %p193_p7 = scmp.eq.s32.totalorder %s1639_s9, 3 }
  0x18   : > { %p1640_p8 = scmp.ge.s32.totalorder %s2149_s7, 1  ;;  %p200_p9 = scmp.lt.s32.totalorder %s2149_s7, 5 }
  0x19   : > { %p2281_p10 = por %p193_p7, %p192_p5  ;;  %s2831_s1 = sld [smem:[#allocation23_spill]] }
  0x1a   : > { %p2285_p11 = pnand %p1640_p8, %p200_p9  ;;  %s2151_s18 = smov [#allocation7]  }
  0x1b   : > { %s2828_s13 = scalar_select %p2281_p10, 1, 0 }
  0x1c   : > { %p1714_p12 = pneg %p2285_p11  ;;  %s213_s19 = sshll.u32 %s2151_s18, 4  ;;  %s214_s19 = int_to_ptr.vmem [resolvable:$true] %s213_s19 }
  0x1d   : > { %2829 = sst [smem:[#allocation20_spill]] %s2828_s13  ;;  %s2811_s15 = smov 128  }
  0x1e   : > { %p2296_p13 = pnand %p1714_p12, %p2261_p1  ;;  %s2833_s3 = sld [smem:[#allocation25_spill]] }
  0x1f   : > { %s211_s17 = sshll.u32 %s2831_s1, 4  ;;  %s2812_s16 = smov 8   ;;  %s212_s17 = int_to_ptr.hbm [resolvable:$true] %s211_s17 }
  0x20   : > { %1717 = dma.hbm_to_vmem [thread:$0]  (!%p2296_p13), %s212_s17, 512, %s214_s19, [#allocation8], %s2811_s15, %s2811_s15, %s2812_s16  }
  0x21   : > { %s2834_s2 = sld [smem:[#allocation24_spill]]  ;;  %s2154_s21 = smov [#allocation10]  }
  0x22   : > { %s241_s24 = sshll.u32 %s2154_s21, 4  ;;  %s2155_s17 = smov [#allocation9]   ;;  %s242_s24 = int_to_ptr.vmem [resolvable:$true] %s241_s24 }
  0x23   : > { %s227_s19 = sshll.u32 %s2155_s17, 4  ;;  %s2835_s4 = sld [smem:[#allocation26_spill]]  ;;  %s228_s19 = int_to_ptr.vmem [resolvable:$true] %s227_s19 }
  0x24   : > { %s239_s9 = sshll.u32 %s2833_s3, 4  ;;  %s2156_s21 = smov [#allocation12]   ;;  %s240_s9 = int_to_ptr.hbm [resolvable:$true] %s239_s9 }
  0x25   : > { %1723 = dma.hbm_to_vmem [thread:$0]  (!%p2296_p13), %s240_s9, 512, %s242_s24, [#allocation11], %s2811_s15, %s2811_s15, %s2812_s16  }
  0x26   : > { %s255_s9 = sshll.u32 %s2156_s21, 4  ;;  %s33_s24 = sadd.s32 1, %s2141_s29  ;;  %s256_s9 = int_to_ptr.vmem [resolvable:$true] %s255_s9 }
  0x27   : > { %s225_s13 = sshll.u32 %s2834_s2, 4  ;;  %p34_p0 = scmp.ge.s32.totalorder %s33_s24, 2  ;;  %s226_s13 = int_to_ptr.hbm [resolvable:$true] %s225_s13 }
  0x28   : > { %1720 = dma.hbm_to_vmem [thread:$0]  (!%p2296_p13), %s226_s13, 512, %s228_s19, [#allocation8], %s2811_s15, %s2811_s15, %s2812_s16  }
  0x29   : > { %s253_s18 = sshll.u32 %s2835_s4, 4  ;;  %s36_s17 = sadd.s32 1, %s2145_s30  ;;  %s254_s18 = int_to_ptr.hbm [resolvable:$true] %s253_s18 }
  0x2a   : > { %1726 = dma.hbm_to_vmem [thread:$0]  (!%p2296_p13), %s254_s18, 512, %s256_s9, [#allocation11], %s2811_s15, %s2811_s15, %s2812_s16  }
  0x2b   : > { %p50_p2 = scmp.ne.s32.totalorder %s2129_s26, %s2125_s25  ;;  %s2857_s24 = smov (%p34_p0, %s33_s24), 0 }
  0x2c   : > { %2836 = sst [smem:[#allocation21_spill]] %s2857_s24  ;;  %s2859_s17 = smov (!%p34_p0, %s36_s17), %s2145_s30 }
  0x2d   : > { %s43_s13 = sadd.s32 1, %s2129_s26  ;;  %p51_p3 = scmp.eq.s32.totalorder %s2149_s7, 0 }
  0x2e   : > { %p38_p5 = scmp.ge.s32.totalorder %s2859_s17, 2  ;;  %s172_s20 = ssub.s32 %s2141_s29, %s2857_s24 }
  0x2f   : > { %p2340_p7 = por %p51_p3, %p50_p2  ;;  %s176_s1 = sadd.s32 1, %s2117_s23 }
  0x30   : > { %s2861_s17 = smov (%p38_p5, %s2859_s17), 0  ;;  %p1739_p8 = scmp.lt.s32.totalorder %s2149_s7, 4 }
  0x31   : > { %2838 = sst [smem:[#allocation22_spill]] %s2861_s17  ;;  %s272_s8 = sand.u32 1, %s2129_s26  }
  0x32   : > { %s40_s18 = ssub.s32 %s2145_s30, %s2861_s17  ;;  %s1685_s21 = sshll.u32 %s2145_s30, 4 }
  0x33   : > { %p41_p9 = scmp.eq.s32.totalorder %s40_s18, 0  ;;  %s173_s9 = sor.u32 %s172_s20, %s40_s18 }
  0x34   : > { %p174_p12 = scmp.eq.s32.totalorder %s173_s9, 0  ;;  %s1646_s15 = sshll.u32 %s272_s8, 4 }
  0x35   : > { %s2353_s16 = scalar_select %p41_p9, %s2129_s26, %s43_s13  }
  0x36   : > { %s2356_s2 = scalar_select %p174_p12, %s2117_s23, %s176_s1  }
  0x37   : > { %s281_s24 = scalar_lea.hbm %s2802_s0, %s1685_s21  ;;  %s276_s5 = scalar_lea.vmem [#allocation4], %s1646_s15 }
  0x38   : > { %s282_s29 = sshll.u32 %s281_s24, 4  ;;  %s284_s6 = sshll.u32 %s276_s5, 4  ;;  %s283_s29 = int_to_ptr.hbm [resolvable:$true] %s282_s29  ;;  %s285_s6 = int_to_ptr.vmem [resolvable:$true] %s284_s6 }
  0x39   : > { %p1728_p13 = pnand %p1739_p8, %p2340_p7  ;;  %s273_s17 = scalar_lea.sflag [#allocation5], %s272_s8 }
  0x3a   : > { %s2839_s20 = smov 8   ;;  %s2840_s18 = smov 128  }
  0x3b   : > { %1730 = dma.hbm_to_vmem [thread:$0]  (!%p1728_p13), %s283_s29, 256, %s285_s6, %s273_s17, %s2840_s18, %s2840_s18, %s2839_s20  }
  0x3c   : > { %296 = sbr.rel (%p2285_p11) target bundleno = 1497 (0x5d9), region = 44  ;;  %s298_s3 = sand.u32 (!%p2285_p11), 1, %s2125_s25  }
  0x3d   : > { %s1650_s4 = sshll.u32 (!%p2285_p11), %s298_s3, 4  ;;  %s299_s24 = scalar_lea.sflag (!%p2285_p11), [#allocation5], %s298_s3 }
  0x3e   : > { %s2371_s15 = scalar_lea.vmem (!%p2285_p11), [#allocation4], %s1650_s4 }
  0x41   : > { %2092 = dma.done.wait (%p2269_p4), %s299_s24, 256  }
  0x42   : > { %2094 = vsyncadd (%p2269_p4), %s299_s24, 4294967040 }
  0x43   : > { %2096 = dma.done.wait (%p2261_p1), [#allocation8], 1024  }
  0x44   : > { %2098 = vsyncadd (%p2261_p1), [#allocation8], 4294966272 }
  0x45   : > { %2100 = dma.done.wait (%p2261_p1), [#allocation11], 1024  }
  0x46   : > { %2102 = vsyncadd (%p2261_p1), [#allocation11], 4294966272  ;;  %s349_s5 = sand.u32 1, %s2113_s22   ;;  %p1656_p4 = scmp.ne.s32.totalorder %s2133_s27, 0 }
  0x47   : > { %s2388_s6 = sshll.u32 %s349_s5, 3  ;;  %s2157_s10 = smov (!%p1656_p4), 112  }
  0x48   : > { %s351_s29 = scalar_lea.vmem [#allocation13], %s2388_s6  ;;  %355 = sbr.rel (%p1656_p4) target bundleno = 401 (0x191), region = 68 }
  0x49   : > { %s2158_s11 = smov (!%p1656_p4), 120   ;;  %s2159_s14 = smov (!%p1656_p4), 104  }
  0x4d   : > { %v361_v0 = vld [vmem:[#allocation9 + $0x18] sm:$0xff]  ;;  %v360_v2 = vld [vmem:[#allocation9 + $0x10] sm:$0xff]  ;;  %v359_v4 = vld [vmem:[#allocation9 + $0x8] sm:$0xff]  ;;  %vm362_vm0 = vcmask 261120   ;;  %v2160_v16 = vmov 1983009808  }
  0x4e   : > { %v395_v1 = vld [vmem:[#allocation10 + $0x18] sm:$0xff]  ;;  %381 = vmatpush.msra.mxu0 %v361_v0  ;;  %v394_v3 = vld [vmem:[#allocation10 + $0x10] sm:$0xff]  ;;  %v393_v5 = vld [vmem:[#allocation10 + $0x8] sm:$0xff]  ;;  %1686 = vmatpush.msra.mxu2 %v361_v0  ;;  %v445_v17 = vunpack.c.l.s4 %v2160_v16  ;;  %vm440_vm1 = vcmask 1047556   ;;  %v2161_v28 = vmov 1934713408  }
  0x4f   : > { %408 = vmatpush.msra.mxu1 %v395_v1  ;;  %1690 = vmatpush.msra.mxu3 %v395_v1  ;;  %v358_v6 = vld [vmem:[#allocation9] sm:$0xff]  ;;  %v357_v9 = vld [vmem:[%s2371_s15 + $0x8] sm:$0xff]  ;;  %v469_v29 = vunpack.c.l.s4 %v2161_v28  ;;  %vm660_vm2 = vcmask 64512  }
  0x50   : > { %382 = vmatpush.msra.mxu0 %v360_v2  ;;  %v392_v7 = vld [vmem:[#allocation10] sm:$0xff]  ;;  %1687 = vmatpush.msra.mxu2 %v360_v2  ;;  %v2403_v23 = vunpack.c.0.s8 %v445_v17 }
  0x51   : > { %409 = vmatpush.msra.mxu1 %v394_v3  ;;  %1691 = vmatpush.msra.mxu3 %v394_v3  ;;  %v356_v8 = vld [vmem:[%s2371_s15] sm:$0xff]  ;;  %v2415_v41 = vunpack.c.0.s8 %v469_v29 }
  0x52   : > { %383 = vmatpush.msra.mxu0 %v359_v4  ;;  %1688 = vmatpush.msra.mxu2 %v359_v4 }
  0x53   : > { %410 = vmatpush.msra.mxu1 %v393_v5  ;;  %1692 = vmatpush.msra.mxu3 %v393_v5 }
  0x54   : > { %384 = vmatpush.msra.mxu0 %v358_v6  ;;  %1689 = vmatpush.msra.mxu2 %v358_v6 }
  0x55   : > { %411 = vmatpush.msra.mxu1 %v392_v7  ;;  %1657 = vmatmul.msk.f32.vlgmr.msra.gmra.mxu0 %vm362_vm0, %v356_v8 }
  0x56   : > { %1659 = vmatmul.msk.f32.vlgmr.msra.gmra.mxu1 %vm362_vm0, %v356_v8  ;;  %1693 = vmatpush.msra.mxu3 %v392_v7 }
  0x57   : > { %1660 = vmatmul.msk.f32.vlgmr.msra.gmra.mxu3 %vm362_vm0, %v357_v9  ;;  %1658 = vmatmul.msk.f32.vlgmr.msra.gmra.mxu2 %vm362_vm0, %v357_v9 }
  0xd2   : > { %v386_v10 = vpop.f32.mrf.mxu0 }
  0xd3   : > { %v413_v11 = vpop.f32.mrf.mxu1  ;;  %421 = vrot.lane.b32.xlu2 %v386_v10, %s2158_s11  ;;  %427 = vrot.lane.b32.xlu0 %v386_v10, %s2157_s10  ;;  %v442_v21 = vrot.slane %v386_v10, 4 }
  0xd4   : > { %677 = vrot.lane.b32.xlu1 %v413_v11, %s2157_s10  ;;  %v691_v26 = vrot.slane %v413_v11, 4 }
  0xda   : > { %v416_v12 = vpop.f32.mrf.mxu3  ;;  %v2394_v13 = vpop.f32.mrf.mxu2 }
  0xdb   : > { %671 = vrot.lane.b32.xlu2 %v413_v11, %s2158_s11  ;;  %433 = vrot.lane.b32.xlu0 %v386_v10, %s2159_s14  ;;  %v747_v30 = vrot.slane %v416_v12, 4  ;;  %v498_v44 = vrot.slane %v2394_v13, 4 }
  0xdc   : > { %679 = vrot.lane.b32.xlu1 %v416_v12, %s2157_s10 }
  0xe3   : > { %423 = vrot.lane.b32.xlu2 %v2394_v13, %s2158_s11  ;;  %429 = vrot.lane.b32.xlu0 %v2394_v13, %s2157_s10 }
  0xe4   : > { %435 = vrot.lane.b32.xlu1 %v2394_v13, %s2159_s14 }
  0xeb   : > { %685 = vrot.lane.b32.xlu2 %v416_v12, %s2159_s14  ;;  %673 = vrot.lane.b32.xlu0 %v416_v12, %s2158_s11 }
  0xec   : > { %683 = vrot.lane.b32.xlu1 %v413_v11, %s2159_s14 }
 0x12d   : > { %v422_v14 = vpop.permute.xlu2 %421 }
 0x12e   : > { %v454_v33 = vrot.slane %v422_v14, 4 }
 0x135   : > { %v2399_v15 = vpop.permute.xlu2 %671 }
 0x136   : > { %v703_v49 = vrot.slane %v2399_v15, 4 }
 0x13d   : > { %v2401_v19 = vpop.permute.xlu2 %423 }
 0x13e   : > { %v510_v57 = vrot.slane %v2401_v19, 4 }
 0x145   : > { %v428_v20 = vpop.permute.xlu0 %427  ;;  %v2422_v46 = vpop.permute.xlu2 %685 }
 0x146   : > { %v678_v18 = vpop.permute.xlu1 %677  ;;  %v439_v22 = vrot.slane %v428_v20, 4  ;;  %v443_v25 = vsel %vm440_vm1, %v428_v20, %v442_v21  ;;  %v757_v59 = vrot.slane %v2422_v46, 4 }
 0x147   : > { %v689_v24 = vrot.slane %v678_v18, 4  ;;  %v692_v31 = vsel %vm440_vm1, %v678_v18, %v691_v26  ;;  %v451_v32 = vperm.slane %v443_v25, %v2403_v23 }
 0x148   : > { %v441_v27 = vsel %vm440_vm1, %v439_v22, %v386_v10  ;;  %v2413_v40 = vperm.slane %v692_v31, %v2403_v23 }
 0x149   : > { %v690_v34 = vsel %vm440_vm1, %v689_v24, %v413_v11  ;;  %v447_v35 = vperm.slane %v441_v27, %v2403_v23  ;;  %v478_v47 = vrot.slane %v451_v32, 4 }
 0x14a   : > { %v2420_v45 = vperm.slane %v690_v34, %v2403_v23  ;;  %v727_v58 = vrot.slane %v2413_v40, 4 }
 0x14b   : > { %v466_v50 = vrot.slane %v447_v35, 4 }
 0x14c   : > { %v715_v61 = vrot.slane %v2420_v45, 4 }
 0x14d   : > { %v434_v39 = vpop.permute.xlu0 %433 }
 0x14e   : > { %v680_v36 = vpop.permute.xlu1 %679  ;;  %v452_v42 = vrot.slane %v434_v39, 4  ;;  %v455_v43 = vsel %vm440_vm1, %v434_v39, %v454_v33 }
 0x14f   : > { %v745_v37 = vrot.slane %v680_v36, 4  ;;  %v748_v38 = vsel %vm440_vm1, %v680_v36, %v747_v30  ;;  %v463_v48 = vperm.slane %v455_v43, %v2403_v23 }
 0x150   : > { %v2427_v51 = vperm.slane %v748_v38, %v2403_v23  ;;  %v453_v52 = vsel %vm440_vm1, %v452_v42, %v422_v14 }
 0x151   : > { %v746_v53 = vsel %vm440_vm1, %v745_v37, %v416_v12  ;;  %v459_v54 = vperm.slane %v453_v52, %v2403_v23  ;;  %v476_v55 = vrot.slane %v463_v48, 4  ;;  %v479_v56 = vsel %vm440_vm1, %v463_v48, %v478_v47 }
 0x152   : > { %v487_v60 = vperm.slane %v479_v56, %v2415_v41  ;;  %v2441_v1 = vperm.slane %v746_v53, %v2403_v23  ;;  %v783_v6 = vrot.slane %v2427_v51, 4 }
 0x153   : > { %v464_v62 = vrot.slane %v459_v54, 4  ;;  %v467_v63 = vsel %vm440_vm1, %v459_v54, %v466_v50  ;;  %v477_v0 = vsel %vm440_vm1, %v476_v55, %v451_v32 }
 0x154   : > { %v475_v2 = vperm.slane %v467_v63, %v2415_v41  ;;  %v483_v3 = vperm.slane %v477_v0, %v2415_v41  ;;  %v494_v4 = vrot.slane %v487_v60, 4 }
 0x155   : > { %v465_v7 = vsel %vm440_vm1, %v464_v62, %v447_v35  ;;  %v430_v26 = vpop.permute.xlu0 %429 }
 0x156   : > { %v436_v5 = vpop.permute.xlu1 %435  ;;  %v471_v10 = vperm.slane %v465_v7, %v2415_v41  ;;  %v490_v11 = vrot.slane %v475_v2, 4  ;;  %v492_v12 = vrot.slane %v483_v3, 4  ;;  %v495_v14 = vsel %vm440_vm1, 0.0, %v494_v4 }
 0x157   : > { %v508_v8 = vrot.slane %v436_v5, 4  ;;  %v511_v9 = vsel %vm440_vm1, %v436_v5, %v510_v57  ;;  %v563_v16 = vsel %vm440_vm1, %v494_v4, %v483_v3  ;;  %v568_v17 = vrot.slane %v495_v14, 4 }
 0x158   : > { %v519_v20 = vperm.slane %v511_v9, %v2403_v23  ;;  %v488_v21 = vrot.slane %v471_v10, 4  ;;  %v491_v22 = vsel %vm440_vm1, 0.0, %v490_v11  ;;  %v493_v24 = vsel %vm440_vm1, 0.0, %v492_v12 }
 0x159   : > { %v509_v18 = vsel %vm440_vm1, %v508_v8, %v2401_v19  ;;  %v552_v25 = vsel %vm440_vm1, %v490_v11, %v471_v10  ;;  %v557_v28 = vrot.slane %v491_v22, 4  ;;  %v567_v29 = vperm.slane %v563_v16, %v2403_v23 }
 0x15a   : > { %v556_v27 = vperm.slane %v552_v25, %v2403_v23  ;;  %v569_v30 = vsel %vm440_vm1, %v568_v17, %v493_v24  ;;  %v489_v19 = vsel %vm440_vm1, 0.0, %v488_v21  ;;  %v515_v32 = vperm.slane %v509_v18, %v2403_v23 }
 0x15b   : > { %v573_v31 = vperm.slane %v569_v30, %v2403_v23  ;;  %v532_v33 = vrot.slane %v519_v20, 4  ;;  %v558_v34 = vsel %vm440_vm1, %v557_v28, %v489_v19  ;;  %v588_v36 = vrot.slane %v567_v29, 4 }
 0x15c   : > { %v576_v35 = vrot.slane %v556_v27, 4  ;;  %v496_v37 = vrot.slane %v430_v26, 4  ;;  %v562_v38 = vperm.slane %v558_v34, %v2403_v23  ;;  %v520_v42 = vrot.slane %v515_v32, 4 }
 0x15d   : > { %v586_v39 = vrot.slane %v573_v31, 4  ;;  %v499_v43 = vsel %vm440_vm1, %v430_v26, %v498_v44  ;;  %v589_v48 = vsel %vm440_vm1, %v573_v31, %v588_v36  ;;  %v2492_v26 = vpop.permute.xlu0 %673 }
 0x15e   : > { %v684_v47 = vpop.permute.xlu1 %683  ;;  %v497_v50 = vsel %vm440_vm1, %v496_v37, %v2394_v13  ;;  %v507_v52 = vperm.slane %v499_v43, %v2403_v23  ;;  %v574_v54 = vrot.slane %v562_v38, 4  ;;  %v577_v55 = vsel %vm440_vm1, %v562_v38, %v576_v35 }
 0x15f   : > { %v701_v53 = vrot.slane %v684_v47, 4  ;;  %v587_v56 = vsel %vm440_vm1, %v586_v39, %v567_v29  ;;  %v597_v57 = vperm.slane %v589_v48, %v2415_v41  ;;  %v585_v60 = vperm.slane %v577_v55, %v2415_v41 }
 0x160   : > { %v593_v44 = vperm.slane %v587_v56, %v2415_v41  ;;  %v503_v62 = vperm.slane %v497_v50, %v2403_v23  ;;  %v533_v63 = vsel %vm440_vm1, %v532_v33, %v507_v52  ;;  %v575_v13 = vsel %vm440_vm1, %v574_v54, %v556_v27 }
 0x161   : > { %v602_v0 = vrot.slane %v597_v57, 4  ;;  %v534_v2 = vrot.slane %v507_v52, 4  ;;  %v539_v3 = vperm.slane %v533_v63, %v2415_v41  ;;  %v581_v4 = vperm.slane %v575_v13, %v2415_v41 }
 0x162   : > { %v598_v5 = vrot.slane %v593_v44, 4  ;;  %v604_v7 = vrot.slane %v585_v60, 4  ;;  %v521_v8 = vsel %vm440_vm1, %v520_v42, %v503_v62  ;;  %v522_v10 = vrot.slane %v503_v62, 4 }
 0x163   : > { %v603_v9 = vsel %vm440_vm1, %v602_v0, %v585_v60  ;;  %v527_v11 = vperm.slane %v521_v8, %v2415_v41  ;;  %v535_v12 = vsel %vm440_vm1, %v519_v20, %v534_v2  ;;  %v600_v16 = vrot.slane %v581_v4, 4 }
 0x164   : > { %v599_v14 = vsel %vm440_vm1, %v598_v5, %v581_v4  ;;  %v605_v17 = vsel %vm440_vm1, %v597_v57, %v604_v7  ;;  %665 = vst.msk [vmem:[#allocation2 + $0x20] sm:$0xff] %vm660_vm2, %v603_v9  ;;  %v543_v18 = vperm.slane %v535_v12, %v2415_v41  ;;  %v523_v21 = vsel %vm440_vm1, %v515_v32, %v522_v10 }
 0x165   : > { %661 = vst.msk [vmem:[#allocation2] sm:$0xff] %vm660_vm2, %v599_v14  ;;  %v544_v22 = vrot.slane %v527_v11, 4  ;;  %v548_v24 = vrot.slane %v539_v3, 4  ;;  %v702_v25 = vsel %vm440_vm1, %v701_v53, %v2399_v15  ;;  %v601_v20 = vsel %vm440_vm1, %v593_v44, %v600_v16 }
 0x166   : > { %667 = vst.msk [vmem:[#allocation2 + $0x30] sm:$0xff] %vm660_vm2, %v605_v17  ;;  %v531_v27 = vperm.slane %v523_v21, %v2415_v41  ;;  %v550_v28 = vrot.slane %v543_v18, 4  ;;  %v704_v29 = vsel %vm440_vm1, %v684_v47, %v703_v49  ;;  %v708_v31 = vperm.slane %v702_v25, %v2403_v23 }
 0x167   : > { %663 = vst.msk [vmem:[#allocation2 + $0x10] sm:$0xff] %vm660_vm2, %v601_v20  ;;  %v545_v30 = vsel %vm440_vm1, 0.0, %v544_v22  ;;  %v549_v19 = vsel %vm440_vm1, 0.0, %v548_v24  ;;  %v712_v32 = vperm.slane %v704_v29, %v2403_v23  ;;  %v2511_v15 = vsel %vm440_vm1, %v757_v59, %v2492_v26 }
 0x168   : > { %v546_v33 = vrot.slane %v531_v27, 4  ;;  %v551_v34 = vsel %vm440_vm1, 0.0, %v550_v28  ;;  %v617_v35 = vsel %vm440_vm1, %v550_v28, %v539_v3  ;;  %v713_v37 = vrot.slane %v708_v31, 4 }
 0x169   : > { %v621_v49 = vperm.slane %v617_v35, %v2403_v23  ;;  %v622_v36 = vrot.slane %v551_v34, 4  ;;  %v716_v38 = vsel %vm440_vm1, %v708_v31, %v715_v61  ;;  %v725_v47 = vrot.slane %v712_v32, 4 }
 0x16a   : > { %v547_v39 = vsel %vm440_vm1, 0.0, %v546_v33  ;;  %v606_v42 = vsel %vm440_vm1, %v546_v33, %v527_v11  ;;  %v724_v43 = vperm.slane %v716_v38, %v2415_v41  ;;  %v714_v54 = vsel %vm440_vm1, %v713_v37, %v2420_v45 }
 0x16b   : > { %v610_v48 = vperm.slane %v606_v42, %v2403_v23  ;;  %v611_v50 = vrot.slane %v547_v39, 4  ;;  %v623_v59 = vsel %vm440_vm1, %v622_v36, %v549_v19  ;;  %v642_v52 = vrot.slane %v621_v49, 4 }
 0x16c   : > { %v627_v53 = vperm.slane %v623_v59, %v2403_v23  ;;  %v726_v61 = vsel %vm440_vm1, %v725_v47, %v2413_v40  ;;  %v728_v55 = vsel %vm440_vm1, %v712_v32, %v727_v58  ;;  %v720_v60 = vperm.slane %v714_v54, %v2415_v41 }
 0x16d   : > { %v612_v56 = vsel %vm440_vm1, %v611_v50, %v545_v30  ;;  %v630_v57 = vrot.slane %v610_v48, 4  ;;  %v732_v44 = vperm.slane %v726_v61, %v2415_v41  ;;  %v736_v45 = vperm.slane %v728_v55, %v2415_v41 }
 0x16e   : > { %v616_v62 = vperm.slane %v612_v56, %v2403_v23  ;;  %v640_v63 = vrot.slane %v627_v53, 4  ;;  %v643_v13 = vsel %vm440_vm1, %v627_v53, %v642_v52  ;;  %v737_v2 = vrot.slane %v720_v60, 4 }
 0x16f   : > { %v651_v0 = vperm.slane %v643_v13, %v2415_v41  ;;  %v739_v40 = vrot.slane %v724_v43, 4  ;;  %v741_v3 = vrot.slane %v732_v44, 4  ;;  %v743_v7 = vrot.slane %v736_v45, 4 }
 0x170   : > { %v628_v58 = vrot.slane %v616_v62, 4  ;;  %v631_v4 = vsel %vm440_vm1, %v616_v62, %v630_v57  ;;  %v641_v5 = vsel %vm440_vm1, %v640_v63, %v621_v49  ;;  %v738_v11 = vsel %vm440_vm1, 0.0, %v737_v2 }
 0x171   : > { %v639_v8 = vperm.slane %v631_v4, %v2415_v41  ;;  %v647_v9 = vperm.slane %v641_v5, %v2415_v41  ;;  %v656_v10 = vrot.slane %v651_v0, 4  ;;  %v740_v14 = vsel %vm440_vm1, 0.0, %v739_v40 }
 0x172   : > { %v629_v12 = vsel %vm440_vm1, %v628_v58, %v610_v48  ;;  %v742_v16 = vsel %vm440_vm1, 0.0, %v741_v3  ;;  %v744_v17 = vsel %vm440_vm1, 0.0, %v743_v7  ;;  %v801_v25 = vsel %vm440_vm1, %v739_v40, %v720_v60 }
 0x173   : > { %v635_v18 = vperm.slane %v629_v12, %v2415_v41  ;;  %v652_v21 = vrot.slane %v647_v9, 4  ;;  %v657_v22 = vsel %vm440_vm1, %v656_v10, %v639_v8  ;;  %v658_v24 = vrot.slane %v639_v8, 4 }
 0x174   : > { %666 = vst.msk [vmem:[#allocation2 + $0x28] sm:$0xff] %vm660_vm2, %v657_v22  ;;  %v806_v20 = vrot.slane %v740_v14, 4  ;;  %v812_v27 = vsel %vm440_vm1, %v743_v7, %v732_v44  ;;  %v817_v28 = vrot.slane %v744_v17, 4  ;;  %v805_v31 = vperm.slane %v801_v25, %v2403_v23 }
 0x175   : > { %v653_v29 = vsel %vm440_vm1, %v652_v21, %v635_v18  ;;  %v654_v30 = vrot.slane %v635_v18, 4  ;;  %v659_v19 = vsel %vm440_vm1, %v651_v0, %v658_v24  ;;  %v816_v33 = vperm.slane %v812_v27, %v2403_v23 }
 0x176   : > { %662 = vst.msk [vmem:[#allocation2 + $0x8] sm:$0xff] %vm660_vm2, %v653_v29  ;;  %v807_v32 = vsel %vm440_vm1, %v806_v20, %v738_v11  ;;  %v818_v34 = vsel %vm440_vm1, %v817_v28, %v742_v16  ;;  %v759_v35 = vrot.slane %v2492_v26, 4  ;;  %v825_v38 = vrot.slane %v805_v31, 4 }
 0x177   : > { %v655_v49 = vsel %vm440_vm1, %v647_v9, %v654_v30  ;;  %668 = vst.msk [vmem:[#allocation2 + $0x38] sm:$0xff] %vm660_vm2, %v659_v19  ;;  %v811_v36 = vperm.slane %v807_v32, %v2403_v23  ;;  %v822_v37 = vperm.slane %v818_v34, %v2403_v23  ;;  %v771_v39 = vrot.slane %v2441_v1, 4 }
 0x178   : > { %664 = vst.msk [vmem:[#allocation2 + $0x18] sm:$0xff] %vm660_vm2, %v655_v49  ;;  %v837_v42 = vrot.slane %v816_v33, 4  ;;  %v760_v43 = vsel %vm440_vm1, %v2422_v46, %v759_v35  ;;  %v764_v26 = vperm.slane %v2511_v15, %v2403_v23 }
 0x179   : > { %v823_v47 = vrot.slane %v811_v36, 4  ;;  %v826_v48 = vsel %vm440_vm1, %v811_v36, %v825_v38  ;;  %v835_v50 = vrot.slane %v822_v37, 4  ;;  %v768_v59 = vperm.slane %v760_v43, %v2403_v23 }
 0x17a   : > { %v834_v52 = vperm.slane %v826_v48, %v2415_v41  ;;  %v838_v53 = vsel %vm440_vm1, %v822_v37, %v837_v42  ;;  %v769_v54 = vrot.slane %v764_v26, 4  ;;  %v772_v61 = vsel %vm440_vm1, %v764_v26, %v771_v39 }
 0x17b   : > { %v824_v55 = vsel %vm440_vm1, %v823_v47, %v805_v31  ;;  %v836_v46 = vsel %vm440_vm1, %v835_v50, %v816_v33  ;;  %v846_v56 = vperm.slane %v838_v53, %v2415_v41  ;;  %v780_v15 = vperm.slane %v772_v61, %v2415_v41 }
 0x17c   : > { %v830_v57 = vperm.slane %v824_v55, %v2415_v41  ;;  %v842_v60 = vperm.slane %v836_v46, %v2415_v41  ;;  %v853_v44 = vrot.slane %v834_v52, 4  ;;  %v770_v62 = vsel %vm440_vm1, %v769_v54, %v2441_v1 }
 0x17d   : > { %v851_v63 = vrot.slane %v846_v56, 4  ;;  %v776_v13 = vperm.slane %v770_v62, %v2415_v41  ;;  %v781_v45 = vrot.slane %v768_v59, 4  ;;  %v784_v0 = vsel %vm440_vm1, %v768_v59, %v783_v6 }
 0x17e   : > { %v847_v2 = vrot.slane %v842_v60, 4  ;;  %v849_v40 = vrot.slane %v830_v57, 4  ;;  %v854_v3 = vsel %vm440_vm1, %v846_v56, %v853_v44  ;;  %v792_v58 = vperm.slane %v784_v0, %v2415_v41 }
 0x17f   : > { %v852_v4 = vsel %vm440_vm1, %v851_v63, %v834_v52  ;;  %915 = vst.msk [vmem:[#allocation3 + $0x30] sm:$0xff] %vm660_vm2, %v854_v3  ;;  %v782_v1 = vsel %vm440_vm1, %v781_v45, %v2427_v51  ;;  %v793_v5 = vrot.slane %v776_v13, 4  ;;  %v795_v7 = vrot.slane %v780_v15, 4 }
 0x180   : > { %v848_v8 = vsel %vm440_vm1, %v847_v2, %v830_v57  ;;  %v850_v9 = vsel %vm440_vm1, %v842_v60, %v849_v40  ;;  %913 = vst.msk [vmem:[#allocation3 + $0x20] sm:$0xff] %vm660_vm2, %v852_v4  ;;  %v788_v6 = vperm.slane %v782_v1, %v2415_v41  ;;  %v799_v10 = vrot.slane %v792_v58, 4 }
 0x181   : > { %909 = vst.msk [vmem:[#allocation3] sm:$0xff] %vm660_vm2, %v848_v8  ;;  %v794_v11 = vsel %vm440_vm1, 0.0, %v793_v5  ;;  %v796_v12 = vsel %vm440_vm1, 0.0, %v795_v7  ;;  %v855_v14 = vsel %vm440_vm1, %v795_v7, %v776_v13 }
 0x182   : > { %911 = vst.msk [vmem:[#allocation3 + $0x10] sm:$0xff] %vm660_vm2, %v850_v9  ;;  %v797_v51 = vrot.slane %v788_v6, 4  ;;  %v800_v16 = vsel %vm440_vm1, 0.0, %v799_v10  ;;  %v859_v17 = vperm.slane %v855_v14, %v2403_v23  ;;  %v860_v18 = vrot.slane %v796_v12, 4 }
 0x183   : > { %v866_v21 = vsel %vm440_vm1, %v799_v10, %v788_v6  ;;  %v871_v22 = vrot.slane %v800_v16, 4 }
 0x184   : > { %v798_v24 = vsel %vm440_vm1, 0.0, %v797_v51  ;;  %v861_v25 = vsel %vm440_vm1, %v860_v18, %v794_v11  ;;  %v870_v20 = vperm.slane %v866_v21, %v2403_v23  ;;  %v879_v27 = vrot.slane %v859_v17, 4 }
 0x185   : > { %v865_v28 = vperm.slane %v861_v25, %v2403_v23  ;;  %v872_v29 = vsel %vm440_vm1, %v871_v22, %v798_v24 }
 0x186   : > { %v876_v30 = vperm.slane %v872_v29, %v2403_v23  ;;  %v891_v19 = vrot.slane %v870_v20, 4 }
 0x187   : > { %v877_v31 = vrot.slane %v865_v28, 4  ;;  %v880_v32 = vsel %vm440_vm1, %v865_v28, %v879_v27 }
 0x188   : > { %v888_v33 = vperm.slane %v880_v32, %v2415_v41  ;;  %v889_v34 = vrot.slane %v876_v30, 4  ;;  %v892_v35 = vsel %vm440_vm1, %v876_v30, %v891_v19 }
 0x189   : > { %v878_v49 = vsel %vm440_vm1, %v877_v31, %v859_v17  ;;  %v900_v36 = vperm.slane %v892_v35, %v2415_v41 }
 0x18a   : > { %v884_v37 = vperm.slane %v878_v49, %v2415_v41  ;;  %v890_v38 = vsel %vm440_vm1, %v889_v34, %v870_v20  ;;  %v907_v39 = vrot.slane %v888_v33, 4 }
 0x18b   : > { %v896_v23 = vperm.slane %v890_v38, %v2415_v41  ;;  %v905_v42 = vrot.slane %v900_v36, 4 }
 0x18c   : > { %v903_v43 = vrot.slane %v884_v37, 4  ;;  %v908_v26 = vsel %vm440_vm1, %v900_v36, %v907_v39 }
 0x18d   : > { %v901_v47 = vrot.slane %v896_v23, 4  ;;  %v906_v48 = vsel %vm440_vm1, %v905_v42, %v888_v33  ;;  %916 = vst.msk [vmem:[#allocation3 + $0x38] sm:$0xff] %vm660_vm2, %v908_v26 }
 0x18e   : > { %v904_v50 = vsel %vm440_vm1, %v896_v23, %v903_v43  ;;  %914 = vst.msk [vmem:[#allocation3 + $0x28] sm:$0xff] %vm660_vm2, %v906_v48 }
 0x18f   : > { %v902_v59 = vsel %vm440_vm1, %v901_v47, %v884_v37  ;;  %912 = vst.msk [vmem:[#allocation3 + $0x18] sm:$0xff] %vm660_vm2, %v904_v50 }
 0x190   : > { %910 = vst.msk [vmem:[#allocation3 + $0x8] sm:$0xff] %vm660_vm2, %v902_v59 }
 0x191 PF: > { %v923_v41 = vld [vmem:[#allocation7 + $0x18] sm:$0xff]  ;;  %v922_v52 = vld [vmem:[#allocation7 + $0x10] sm:$0xff]  ;;  %s1661_s17 = sshll.u32 %s2133_s27, 3  ;;  %v921_v53 = vld [vmem:[#allocation7 + $0x8] sm:$0xff]  ;;  %vm924_vm3 = vcmask 261120   ;;  %s2162_s19 = smov 104  }
 0x192   : > { %940 = vmatpush.msra.mxu0 %v923_v41  ;;  %s918_s13 = scalar_lea.vmem %s2371_s15, %s1661_s17 [#allocation4]  ;;  %v920_v54 = vld [vmem:[#allocation7] sm:$0xff]  ;;  %s2163_s1 = smov 120   ;;  %v1074_v46 = vld [vmem:[#allocation2 + $0x28] sm:$0xff]  ;;  %vm1077_vm4 = vcmask 64512   ;;  %v1076_v15 = vld [vmem:[#allocation2 + $0x38] sm:$0xff]  ;;  %vm959_vm5 = vcmask 1047556  }
 0x193   : > { %v919_v61 = vld [vmem:[%s918_s13] sm:$0xff]  ;;  %s2164_s8 = smov 112   ;;  %v1070_v56 = vld [vmem:[#allocation2 + $0x8] sm:$0xff]  ;;  %1669 = vmatpush.xpose.msk.msra.mxu3 %vm1077_vm4, %v1074_v46  ;;  %v1072_v57 = vld [vmem:[#allocation2 + $0x18] sm:$0xff]  ;;  %v2165_v63 = vmov 1983009808  }
 0x194   : > { %941 = vmatpush.msra.mxu0 %v922_v52  ;;  %1663 = vmatpush.xpose.msk.msra.mxu1 %vm1077_vm4, %v1070_v56  ;;  %v1073_v60 = vld [vmem:[#allocation2 + $0x20] sm:$0xff]  ;;  %v1075_v62 = vld [vmem:[#allocation2 + $0x30] sm:$0xff]  ;;  %v964_v13 = vunpack.c.l.s4 %v2165_v63  ;;  %v2166_v5 = vmov 1934713408   ;;  %vm1194_vm6 = vcmask 130048   ;;  %s2167_s21 = smov 16  }
 0x195   : > { %1666 = vmatpush.xpose.msk.msra.mxu2 %vm1077_vm4, %v1072_v57  ;;  %v1069_v44 = vld [vmem:[#allocation2] sm:$0xff]  ;;  %v1071_v45 = vld [vmem:[#allocation2 + $0x10] sm:$0xff]  ;;  %v988_v7 = vunpack.c.l.s4 %v2166_v5  ;;  %s2168_s9 = smov 24   ;;  %s2169_s20 = smov 8   ;;  %vm1463_vm7 = vcmask 195584  }
 0x196   : > { %942 = vmatpush.msra.mxu0 %v921_v53  ;;  %v2637_v58 = vunpack.c.0.s8 %v964_v13  ;;  %s1681_s18 = sshll.u32 %s2137_s28, 1  ;;  %s2841_s10 = sld [smem:[#allocation28_spill]] }
 0x197   : > { %1670 = vmatpush.xpose.msk.msra.mxu3 %vm1077_vm4, %v1073_v60  ;;  %v2643_v11 = vunpack.c.0.s8 %v988_v7  ;;  %s1508_s3 = sadd.s32 %s2133_s27, %s1681_s18  ;;  %s2842_s13 = sld [smem:[#allocation27_spill]] }
 0x198   : > { %943 = vmatpush.msra.mxu0 %v920_v54  ;;  %1664 = vmatpush.xpose.msk.msra.mxu1 %vm1077_vm4, %v1069_v44  ;;  %s1682_s4 = sshll.u32 %s1508_s3, 3  ;;  %s1498_s27 = scalar_lea.sflag [#allocation6], %s349_s5 }
 0x199   : > { %1662 = vmatmul.msk.f32.vlgmr.msra.gmra.mxu0 %vm924_vm3, %v919_v61  ;;  %1667 = vmatpush.xpose.msk.msra.mxu2 %vm1077_vm4, %v1071_v45 }
 0x19a   : > { %1672 = vmatpush.xpose.msk.msrb.mxu0 %vm1077_vm4, %v1076_v15 }
 0x19c   : > { %s1510_s11 = scalar_lea.hbm %s2841_s10, %s1682_s4 }
 0x19e   : > { %1673 = vmatpush.xpose.msk.msrb.mxu0 %vm1077_vm4, %v1075_v62 }
 0x216   : > { %v945_v55 = vpop.f32.mrf.mxu0 }
 0x217   : > { %955 = vrot.lane.b32.xlu1 %v945_v55, %s2162_s19  ;;  %949 = vrot.lane.b32.xlu0 %v945_v55, %s2163_s1  ;;  %v961_v9 = vrot.slane %v945_v55, 4  ;;  %s1512_s19 = sshll.u32 %s351_s29, 4  ;;  %s1514_s1 = sshll.u32 %s1510_s11, 4  ;;  %s1513_s19 = int_to_ptr.vmem [resolvable:$true] %s1512_s19  ;;  %s1515_s1 = int_to_ptr.hbm [resolvable:$true] %s1514_s1 }
 0x218   : > { %s2033_s28 = sshra.s32 %s1515_s1, 4  ;;  %s2034_s28 = int_to_ptr.hbm [resolvable:$true] %s2033_s28 }
 0x219   : > { %p2040_p2 = scmp.lt.s32.totalorder %s2034_s28, %s2841_s10 }
 0x21f   : > { %952 = vrot.lane.b32.xlu0 %v945_v55, %s2164_s8  ;;  %s2035_s8 = scalar_lea.hbm %s2034_s28, 8 }
 0x220   : > { %p2036_p1 = scmp.ne.s32.totalorder %s2034_s28, %s2035_s8 }
 0x222   : > { %p2037_p11 = pnand %p2036_p1, %p2275_p6 }
 0x224   : > { %p2038_p0 = pneg %p2037_p11 }
 0x289   : > { %v956_v0 = vpop.permute.xlu1 %955  ;;  %v950_v2 = vpop.permute.xlu0 %949 }
 0x28a   : > { %v971_v40 = vrot.slane %v956_v0, 4  ;;  %v973_v3 = vrot.slane %v950_v2, 4 }
 0x28c   : > { %v974_v4 = vsel %vm959_vm5, %v956_v0, %v973_v3  ;;  %v972_v1 = vsel %vm959_vm5, %v971_v40, %v950_v2 }
 0x28d   : > { %v982_v8 = vperm.slane %v974_v4, %v2637_v58  ;;  %v978_v6 = vperm.slane %v972_v1, %v2637_v58 }
 0x28f   : > { %v995_v51 = vrot.slane %v982_v8, 4  ;;  %v983_v18 = vrot.slane %v978_v6, 4 }
 0x291   : > { %v953_v10 = vpop.permute.xlu0 %952 }
 0x292   : > { %v958_v12 = vrot.slane %v953_v10, 4  ;;  %v962_v14 = vsel %vm959_vm5, %v953_v10, %v961_v9 }
 0x293   : > { %v970_v16 = vperm.slane %v962_v14, %v2637_v58 }
 0x294   : > { %v960_v17 = vsel %vm959_vm5, %v958_v12, %v945_v55 }
 0x295   : > { %v966_v21 = vperm.slane %v960_v17, %v2637_v58  ;;  %v996_v22 = vsel %vm959_vm5, %v995_v51, %v970_v16  ;;  %v997_v24 = vrot.slane %v970_v16, 4 }
 0x296   : > { %v1002_v25 = vperm.slane %v996_v22, %v2643_v11 }
 0x297   : > { %v984_v20 = vsel %vm959_vm5, %v983_v18, %v966_v21  ;;  %v985_v27 = vrot.slane %v966_v21, 4  ;;  %v998_v28 = vsel %vm959_vm5, %v982_v8, %v997_v24 }
 0x298   : > { %v990_v29 = vperm.slane %v984_v20, %v2643_v11  ;;  %v1006_v30 = vperm.slane %v998_v28, %v2643_v11  ;;  %v1011_v32 = vrot.slane %v1002_v25, 4 }
 0x299   : > { %v986_v19 = vsel %vm959_vm5, %v978_v6, %v985_v27 }
 0x29a   : > { %v994_v31 = vperm.slane %v986_v19, %v2643_v11  ;;  %v1013_v33 = vrot.slane %v1006_v30, 4  ;;  %v1007_v34 = vrot.slane %v990_v29, 4  ;;  %v1012_v23 = vsel %vm959_vm5, 0.0, %v1011_v32 }
 0x29c   : > { %v1009_v35 = vrot.slane %v994_v31, 4  ;;  %v1014_v49 = vsel %vm959_vm5, 0.0, %v1013_v33  ;;  %v1026_v36 = vsel %vm959_vm5, %v1013_v33, %v1002_v25  ;;  %v1008_v50 = vsel %vm959_vm5, 0.0, %v1007_v34 }
 0x29d   : > { %v1030_v37 = vperm.slane %v1026_v36, %v2637_v58  ;;  %v1031_v38 = vrot.slane %v1014_v49, 4  ;;  %v1240_v49 = vld [vmem:[#allocation3 + $0x8] sm:$0xff]  ;;  %v1239_v36 = vld [vmem:[#allocation3] sm:$0xff] }
 0x29e   : > { %v1010_v39 = vsel %vm959_vm5, 0.0, %v1009_v35  ;;  %v1015_v42 = vsel %vm959_vm5, %v1009_v35, %v990_v29  ;;  %1264 = vmatpush.msrb.mxu1 %v1240_v49 }
 0x29f   : > { %v1032_v43 = vsel %vm959_vm5, %v1031_v38, %v1012_v23  ;;  %v1019_v26 = vperm.slane %v1015_v42, %v2637_v58  ;;  %v1020_v47 = vrot.slane %v1010_v39, 4  ;;  %v1051_v48 = vrot.slane %v1030_v37, 4  ;;  %v1243_v38 = vld [vmem:[#allocation3 + $0x20] sm:$0xff]  ;;  %v1242_v39 = vld [vmem:[#allocation3 + $0x18] sm:$0xff]  ;;  %v1241_v23 = vld [vmem:[#allocation3 + $0x10] sm:$0xff] }
 0x2a0   : > { %v1036_v59 = vperm.slane %v1032_v43, %v2637_v58  ;;  %1265 = vmatpush.msrb.mxu1 %v1239_v36  ;;  %1287 = vmatpush.msrb.mxu2 %v1242_v39  ;;  %v1246_v42 = vld [vmem:[#allocation3 + $0x38] sm:$0xff] }
 0x2a1   : > { %v1021_v41 = vsel %vm959_vm5, %v1020_v47, %v1008_v50  ;;  %v1039_v52 = vrot.slane %v1019_v26, 4  ;;  %1333 = vmatpush.msra.mxu0 %v1246_v42 }
 0x2a2   : > { %v1025_v53 = vperm.slane %v1021_v41, %v2637_v58  ;;  %v1052_v54 = vsel %vm959_vm5, %v1036_v59, %v1051_v48  ;;  %v1049_v61 = vrot.slane %v1036_v59, 4  ;;  %1288 = vmatpush.msrb.mxu2 %v1241_v23 }
 0x2a3   : > { %v1060_v55 = vperm.slane %v1052_v54, %v2643_v11 }
 0x2a4   : > { %v1040_v46 = vsel %vm959_vm5, %v1025_v53, %v1039_v52  ;;  %v1037_v56 = vrot.slane %v1025_v53, 4  ;;  %v1050_v15 = vsel %vm959_vm5, %v1049_v61, %v1030_v37  ;;  %v1244_v37 = vld [vmem:[#allocation3 + $0x28] sm:$0xff] }
 0x2a5   : > { %v1048_v57 = vperm.slane %v1040_v46, %v2643_v11  ;;  %v1065_v60 = vrot.slane %v1060_v55, 4  ;;  %v1056_v44 = vperm.slane %v1050_v15, %v2643_v11  ;;  %1310 = vmatpush.msrb.mxu3 %v1244_v37 }
 0x2a6   : > { %v1038_v62 = vsel %vm959_vm5, %v1037_v56, %v1019_v26  ;;  %v1245_v26 = vld [vmem:[#allocation3 + $0x30] sm:$0xff] }
 0x2a7   : > { %v1066_v63 = vsel %vm959_vm5, %v1065_v60, %v1048_v57  ;;  %v1044_v13 = vperm.slane %v1038_v62, %v2643_v11  ;;  %v1061_v45 = vrot.slane %v1056_v44, 4  ;;  %v1067_v0 = vrot.slane %v1048_v57, 4  ;;  %1311 = vmatpush.msrb.mxu3 %v1243_v38  ;;  %1334 = vmatpush.msra.mxu0 %v1245_v26 }
 0x2a8   : > { %1671 = vmatmul.msk.f32.vlgmr.msra.gmra.mxu3 %vm1077_vm4, %v1066_v63 }
 0x2a9   : > { %v1062_v2 = vsel %vm959_vm5, %v1061_v45, %v1044_v13  ;;  %v1068_v40 = vsel %vm959_vm5, %v1060_v55, %v1067_v0  ;;  %v1063_v3 = vrot.slane %v1044_v13, 4 }
 0x2aa   : > { %1665 = vmatmul.msk.f32.vlgmr.msra.gmra.mxu1 %vm1077_vm4, %v1062_v2  ;;  %1674 = vmatmul.msk.f32.vlgmr.msrb.gmra.mxu0 %vm1077_vm4, %v1068_v40 }
 0x2ab   : > { %v1064_v4 = vsel %vm959_vm5, %v1056_v44, %v1063_v3 }
 0x2ac   : > { %1668 = vmatmul.msk.f32.vlgmr.msra.gmra.mxu2 %vm1077_vm4, %v1064_v4 }
 0x327   : > { %v1191_v1 = vpop.f32.mrf.mxu0  ;;  %v1104_v10 = vpop.f32.mrf.mxu1 }
 0x328   : > { %v1204_v5 = vsel %vm1194_vm6, %v1191_v1, -inf  ;;  %v1195_v12 = vsel %vm1194_vm6, %v1104_v10, -inf }
 0x329   : > { %1205 = vmax.xlane.f32.xlu0 %v1204_v5 }
 0x32b   : > { %v1162_v7 = vpop.f32.mrf.mxu3 }
 0x32c   : > { %v1201_v8 = vsel %vm1194_vm6, %v1162_v7, -inf }
 0x32d   : > { %1202 = vmax.xlane.f32.xlu1 %v1201_v8 }
 0x32f   : > { %v1133_v9 = vpop.f32.mrf.mxu2 }
 0x330   : > { %v1198_v6 = vsel %vm1194_vm6, %v1133_v9, -inf }
 0x331   : > { %1199 = vmax.xlane.f32.xlu2 %v1198_v6 }
 0x339   : > { %1196 = vmax.xlane.f32.xlu2 %v1195_v12 }
 0x39c   : > { %v1206_v28 = vpop.xlane.xlu0 %1205 }
 0x39d   : > { %v1210_v30 = vsub.f32 %v1191_v1, %v1206_v28 }
 0x39f   : > { %v1217_v31 = vmul.f32 1.442695, %v1210_v30 }
 0x3a0   : > { %v1203_v51 = vpop.xlane.xlu1 %1202 }
 0x3a1   : > { %v1209_v18 = vsub.f32 %v1162_v7, %v1203_v51 }
 0x3a3   : > { %v1215_v22 = vmul.f32 1.442695, %v1209_v18 }
 0x3a4   : > { %v1200_v14 = vpop.xlane.xlu2 %1199 }
 0x3a5   : > { %v1208_v25 = vsub.f32 %v1133_v9, %v1200_v14 }
 0x3a7   : > { %v1213_v27 = vmul.f32 1.442695, %v1208_v25 }
 0x3ac   : > { %v1197_v16 = vpop.xlane.xlu2 %1196 }
 0x3ad   : > { %v1207_v17 = vsub.f32 %v1104_v10, %v1197_v16 }
 0x3af   : > { %v1211_v21 = vmul.f32 1.442695, %v1207_v17 }
 0x3b1   : > { %1853 = vpow2.f32 %v1211_v21 }
 0x3b2   : > { %1855 = vpow2.f32 %v1215_v22 }
 0x3b3   : > { %1857 = vpow2.f32 %v1213_v27 }
 0x3b4   : > { %1859 = vpow2.f32 %v1217_v31 }
 0x3b7   : > { %v1854_v24 = vpop.eup %1853 }
 0x3b8   : > { %v1219_v20 = vsel %vm1194_vm6, %v1854_v24, 0.0  ;;  %v1856_v29 = vpop.eup %1855 }
 0x3b9   : > { %1220 = vadd.xlane.f32.xlu2 %v1219_v20  ;;  %v1225_v19 = vsel %vm1194_vm6, %v1856_v29, 0.0  ;;  %v1858_v32 = vpop.eup %1857 }
 0x3ba   : > { %v1222_v33 = vsel %vm1194_vm6, %v1858_v32, 0.0  ;;  %v1860_v34 = vpop.eup %1859 }
 0x3bb   : > { %v1228_v35 = vsel %vm1194_vm6, %v1860_v34, 0.0 }
 0x3c1   : > { %1226 = vadd.xlane.f32.xlu2 %v1225_v19 }
 0x3c9   : > { %1223 = vadd.xlane.f32.xlu2 %v1222_v33 }
 0x3d1   : > { %1229 = vadd.xlane.f32.xlu2 %v1228_v35 }
 0x42c   : > { %v1221_v43 = vpop.xlane.xlu2 %1220 }
 0x42d   : > { %1861 = vrcp.f32 %v1221_v43 }
 0x433   : > { %v1862_v47 = vpop.eup %1861 }
 0x434   : > { %v1227_v48 = vpop.xlane.xlu2 %1226  ;;  %v1235_v50 = vmul.f32 %v1862_v47, %v1854_v24 }
 0x435   : > { %1863 = vrcp.f32 %v1227_v48 }
 0x436   : > { %1675 = vmatmul.msk.f32.vlgmr.msrb.gmra.mxu1 %vm1194_vm6, %v1235_v50 }
 0x43b   : > { %v1864_v59 = vpop.eup %1863 }
 0x43c   : > { %v1224_v41 = vpop.xlane.xlu2 %1223  ;;  %v1237_v52 = vmul.f32 %v1864_v59, %v1856_v29 }
 0x43d   : > { %1865 = vrcp.f32 %v1224_v41 }
 0x43e   : > { %1677 = vmatmul.msk.f32.vlgmr.msrb.gmra.mxu3 %vm1194_vm6, %v1237_v52 }
 0x443   : > { %v1866_v53 = vpop.eup %1865 }
 0x444   : > { %v1230_v54 = vpop.xlane.xlu2 %1229  ;;  %v1236_v61 = vmul.f32 %v1866_v53, %v1858_v32 }
 0x445   : > { %1867 = vrcp.f32 %v1230_v54 }
 0x446   : > { %1676 = vmatmul.msk.f32.vlgmr.msrb.gmra.mxu2 %vm1194_vm6, %v1236_v61 }
 0x44b   : > { %v1868_v55 = vpop.eup %1867 }
 0x44c   : > { %v1238_v46 = vmul.f32 %v1868_v55, %v1860_v34 }
 0x44e   : > { %1678 = vmatmul.msk.f32.vlgmr.msra.gmra.mxu0 %vm1194_vm6, %v1238_v46 }
 0x4b3   : > { %v1267_v56 = vpop.f32.mrf.mxu1 }
 0x4b4   : > { %v1341_v57 = vrot.slane %v1267_v56, 4 }
 0x4c1   : > { %v1313_v15 = vpop.f32.mrf.mxu3 }
 0x4c2   : > { %v1339_v60 = vrot.slane %v1313_v15, 4  ;;  %v1342_v44 = vsel %vm959_vm5, %v1313_v15, %v1341_v57 }
 0x4c3   : > { %v1350_v63 = vperm.slane %v1342_v44, %v2637_v58  ;;  %v1467_v44 = vld [vmem:[#allocation12 + $0x10] sm:$0xff] }
 0x4c4   : > { %v1340_v62 = vsel %vm959_vm5, %v1339_v60, %v1267_v56  ;;  %v1468_v60 = vld [vmem:[#allocation12 + $0x18] sm:$0xff] }
 0x4c5   : > { %v1346_v0 = vperm.slane %v1340_v62, %v2637_v58  ;;  %v1377_v4 = vrot.slane %v1350_v63, 4  ;;  %1488 = vmatpush.msra.mxu1 %v1468_v60  ;;  %v1465_v62 = vld [vmem:[#allocation12] sm:$0xff] }
 0x4c7   : > { %v1365_v7 = vrot.slane %v1346_v0, 4  ;;  %1489 = vmatpush.msra.mxu1 %v1467_v44 }
 0x4c9   : > { %v1290_v13 = vpop.f32.mrf.mxu2 }
 0x4ca   : > { %v1353_v45 = vrot.slane %v1290_v13, 4 }
 0x4cb   : > { %v1336_v2 = vpop.f32.mrf.mxu0 }
 0x4cc   : > { %v1351_v40 = vrot.slane %v1336_v2, 4  ;;  %v1354_v3 = vsel %vm959_vm5, %v1336_v2, %v1353_v45 }
 0x4cd   : > { %v1362_v1 = vperm.slane %v1354_v3, %v2637_v58  ;;  %v1852_v3 = vld [vmem:[%s2842_s13] ss:$0 sm:$0xff] }
 0x4ce   : > { %v1352_v5 = vsel %vm959_vm5, %v1351_v40, %v1290_v13 }
 0x4cf   : > { %v1358_v8 = vperm.slane %v1352_v5, %v2637_v58  ;;  %v1375_v9 = vrot.slane %v1362_v1, 4  ;;  %v1378_v6 = vsel %vm959_vm5, %v1362_v1, %v1377_v4 }
 0x4d0   : > { %v1386_v10 = vperm.slane %v1378_v6, %v2643_v11 }
 0x4d1   : > { %v1363_v12 = vrot.slane %v1358_v8, 4  ;;  %v1366_v14 = vsel %vm959_vm5, %v1358_v8, %v1365_v7  ;;  %v1376_v51 = vsel %vm959_vm5, %v1375_v9, %v1350_v63 }
 0x4d2   : > { %v1374_v16 = vperm.slane %v1366_v14, %v2643_v11  ;;  %v1382_v17 = vperm.slane %v1376_v51, %v2643_v11  ;;  %v1393_v18 = vrot.slane %v1386_v10, 4 }
 0x4d3   : > { %v1364_v21 = vsel %vm959_vm5, %v1363_v12, %v1346_v0 }
 0x4d4   : > { %v1370_v22 = vperm.slane %v1364_v21, %v2643_v11  ;;  %v1389_v24 = vrot.slane %v1374_v16, 4  ;;  %v1391_v25 = vrot.slane %v1382_v17, 4  ;;  %v1394_v20 = vsel %vm959_vm5, 0.0, %v1393_v18 }
 0x4d5   : > { %v1406_v27 = vsel %vm959_vm5, %v1393_v18, %v1382_v17  ;;  %v1411_v28 = vrot.slane %v1394_v20, 4 }
 0x4d6   : > { %v1387_v29 = vrot.slane %v1370_v22, 4  ;;  %v1390_v30 = vsel %vm959_vm5, 0.0, %v1389_v24  ;;  %v1392_v19 = vsel %vm959_vm5, 0.0, %v1391_v25  ;;  %v1410_v31 = vperm.slane %v1406_v27, %v2637_v58 }
 0x4d7   : > { %v1400_v32 = vrot.slane %v1390_v30, 4  ;;  %v1395_v33 = vsel %vm959_vm5, %v1389_v24, %v1370_v22  ;;  %v1412_v34 = vsel %vm959_vm5, %v1411_v28, %v1392_v19 }
 0x4d8   : > { %v1388_v35 = vsel %vm959_vm5, 0.0, %v1387_v29  ;;  %v1399_v49 = vperm.slane %v1395_v33, %v2637_v58  ;;  %v1416_v36 = vperm.slane %v1412_v34, %v2637_v58  ;;  %v1431_v37 = vrot.slane %v1410_v31, 4 }
 0x4d9   : > { %v1401_v38 = vsel %vm959_vm5, %v1400_v32, %v1388_v35 }
 0x4da   : > { %v1405_v39 = vperm.slane %v1401_v38, %v2637_v58  ;;  %v1419_v23 = vrot.slane %v1399_v49, 4  ;;  %v1432_v42 = vsel %vm959_vm5, %v1416_v36, %v1431_v37  ;;  %v1429_v43 = vrot.slane %v1416_v36, 4 }
 0x4db   : > { %v1440_v26 = vperm.slane %v1432_v42, %v2643_v11 }
 0x4dc   : > { %v1420_v47 = vsel %vm959_vm5, %v1405_v39, %v1419_v23  ;;  %v1417_v48 = vrot.slane %v1405_v39, 4  ;;  %v1430_v50 = vsel %vm959_vm5, %v1429_v43, %v1410_v31 }
 0x4dd   : > { %v1428_v59 = vperm.slane %v1420_v47, %v2643_v11  ;;  %v1445_v41 = vrot.slane %v1440_v26, 4  ;;  %v1436_v52 = vperm.slane %v1430_v50, %v2643_v11 }
 0x4de   : > { %v1418_v53 = vsel %vm959_vm5, %v1417_v48, %v1399_v49 }
 0x4df   : > { %v1446_v58 = vsel %vm959_vm5, %v1445_v41, %v1428_v59  ;;  %v1447_v54 = vrot.slane %v1428_v59, 4  ;;  %v1424_v61 = vperm.slane %v1418_v53, %v2643_v11  ;;  %v1441_v55 = vrot.slane %v1436_v52, 4  ;;  %v1466_v11 = vld [vmem:[#allocation12 + $0x8] sm:$0xff] }
 0x4e0   : > { %1454 = vrot.lane.b32.xlu1 %v1446_v58, %s2167_s21  ;;  %1490 = vmatpush.msra.mxu1 %v1466_v11 }
 0x4e1   : > { %v1448_v46 = vsel %vm959_vm5, %v1440_v26, %v1447_v54  ;;  %v1443_v56 = vrot.slane %v1424_v61, 4  ;;  %v1442_v15 = vsel %vm959_vm5, %v1441_v55, %v1424_v61 }
 0x4e2   : > { %1458 = vrot.lane.b32.xlu0 %v1448_v46, %s2168_s9  ;;  %1491 = vmatpush.msra.mxu1 %v1465_v62 }
 0x4e3   : > { %v1444_v57 = vsel %vm959_vm5, %v1436_v52, %v1443_v56 }
 0x4e4   : > { %1450 = vrot.lane.b32.xlu2 %v1444_v57, %s2169_s20  ;;  %s2039_s20 = scalar_lea.hbm %s2841_s10, 32 }
 0x4e5   : > { %p2041_p3 = scmp.lt.s32.totalorder %s2039_s20, %s2035_s8 }
 0x4e7   : > { %p2042_p5 = por %p2041_p3, %p2040_p2 }
 0x4e9   : > { %p2043_p7 = pnand %p2042_p5, %p2038_p0 }
 0x53e   : > { %v1451_v63 = vpop.permute.xlu2 %1450 }
 0x53f   : > { %v1461_v13 = vsel %vm1077_vm4, %v1442_v15, %v1451_v63 }
 0x552   : > { %v1455_v45 = vpop.permute.xlu1 %1454 }
 0x553   : > { %v1462_v0 = vsel %vm1194_vm6, %v1461_v13, %v1455_v45 }
 0x554   : > { %v1459_v2 = vpop.permute.xlu0 %1458 }
 0x555   : > { %v1464_v40 = vsel %vm1463_vm7, %v1462_v0, %v1459_v2 }
 0x556   : > { %1679 = vmatmul.msk.f32.vlgmr.msra.gmra.mxu1 %vm924_vm3, %v1464_v40 }
 0x5d3   : > { %v1493_v4 = vpop.f32.mrf.mxu1 }
 0x5d4   : > { %v1494_v1 = vadd.f32 %v1852_v3, %v1493_v4 }
 0x5d6   : > { %1496 = vst.msk [vmem:[%s351_s29] sm:$0xff] %vm924_vm3, %v1494_v1 }
 0x5d7   : > { %2046 = shalt.err (!%p2043_p7)
}
 0x5d8   : > { %1712 = dma.vmem_to_hbm [thread:$0]  (%p2275_p6), %s1513_s19, 128, %s1515_s1, %s1498_s27  }
 0x5d9 PF: > { %s2843_s5 = sld [smem:[#allocation18_spill]]  ;;  %p1744_p8 = scmp.ge.s32.totalorder %s2149_s7, 2 }
 0x5db   : > { %p1732_p9 = pnand %p1744_p8, %p2281_p10 }
 0x5dd   : > { %p1733_p12 = pneg %p1732_p9 }
 0x5df   : > { %s1526_s29 = sand.u32 1, %s2843_s5  }
 0x5e0   : > { %s1527_s4 = scalar_lea.sflag [#allocation6], %s1526_s29 }
 0x5e1   : > { %2104 = dma.done.wait (%p1733_p12), %s1527_s4, 128  }
 0x5e2   : > { %2106 = vsyncadd (%p1733_p12), %s1527_s4, 4294967168  ;;  %s24_s7 = sadd.s32 1, %s2149_s7   ;;  %s2845_s27 = sld [smem:[#allocation19_spill]] }
 0x5e3   : > { %p21_p13 = scmp.ge.s32.totalorder %s24_s7, 6   ;;  %s2846_s29 = sld [smem:[#allocation21_spill]] }
 0x5e4   : > { %s2847_s12 = sld [smem:[#allocation22_spill]]  ;;  %s2848_s21 = smov %s2113_s22 }
 0x5e5   : > { %s2849_s22 = smov %s2117_s23  ;;  %s2850_s23 = smov %s2356_s2 }
 0x5e6   : > { %s2851_s24 = smov %s2125_s25  ;;  %s2852_s25 = smov %s2129_s26 }
 0x5e7   : > { %s2853_s26 = smov %s2353_s16  ;;  %s2854_s28 = smov %s2145_s30 }
 0x5e8   :  { %23 = sbr.rel (!%p21_p13) target bundleno = 18 (0x12), region = 110 }
 0x5ea   : > { %s2855_s30 = smov %s2847_s12 }
 0x5ed   :  { %1533 = vsyncpa [#allocation5], 1 }
 0x5ee   :  { %1535 = vsyncpa [#allocation5 + $0x1], 1 }
 0x5ef   :  { %1536 = vsyncpa [#allocation8], 1 }
 0x5f0   :  { %1537 = vsyncpa [#allocation11], 1 }
 0x5f1   :  { %1538 = vsyncpa [#allocation6], 1 }
 0x5f2   :  { %1540 = vsyncpa [#allocation6 + $0x1], 1 }

</bundles_post_ra>
